<compile_context>
chip_gen: v6e
topology: v6e:2x2x1
jax: 0.10.0
libtpu: 0.0.40
codegen_flags: <defaults>
</compile_context>

<pallas_src>
import jax
import jax.numpy as jnp
import numpy as np
from jax import lax
from jax.experimental import pallas as pl
from jax.experimental.pallas import tpu as pltpu

T = 25  # fixed by the module's forward (concatenates output1[0..24])


def rnn2_kernel(x2d_ref, h0_ref, wih_t_ref, whh_t_ref, bias_ref,
                wout_r_ref, bout_ref,
                out_ref, hT_ref,
                xp_sc):
    """Single-invocation fused RNN + (concat+Linear folded into the loop).

    x2d_ref   : (T*Bp, I)   time-major flattened input, batch padded to Bp
    h0_ref    : (1, Bp, H)  initial hidden (padded)
    wih_t_ref : (I, H)      W_ih^T (pre-transposed)
    whh_t_ref : (H, H)      W_hh^T (pre-transposed)
    bias_ref  : (1, H)      b_ih + b_hh (folded)
    wout_r_ref: (T, O, H)   Linear weight, lane-dense per-timestep slabs
    bout_ref  : (1, O)      Linear bias
    out_ref   : (Bp, O)
    hT_ref    : (1, Bp, H)
    xp_sc     : (T, Bp, H)  f32 VMEM scratch for the hoisted input projection
    """
    Tn = wout_r_ref.shape[0]
    Bp = h0_ref.shape[1]
    H = whh_t_ref.shape[0]
    O = out_ref.shape[1]

    # (1) Hoisted input projection: one (T*Bp, I) @ (I, H) matmul + folded
    #     bias, spilled once into a (T, Bp, H) scratch (aligned per-step reads,
    #     bounded vreg pressure).
    xp = jnp.dot(x2d_ref[...].astype(jnp.float32), wih_t_ref[...],
                 preferred_element_type=jnp.float32) + bias_ref[...]
    xp_sc[...] = xp.reshape(Tn, Bp, H)

    whh_t = whh_t_ref[...]                               # (H, H), loop-invariant
    h = h0_ref[0].astype(jnp.float32)                    # (Bp, H)
    out_acc = jnp.zeros((Bp, O), dtype=jnp.float32)      # Linear accumulator

    # (2) Serial recurrence, fully unrolled (Tn == 25, compile-time constant).
    #     Only h @ W_hh^T + xp_t + tanh sits on the critical dependency chain;
    #     the output-projection accumulation is off the chain and hides under
    #     the recurrence latency.
    for t in range(Tn):
        pre = xp_sc[t] + jnp.dot(h, whh_t, preferred_element_type=jnp.float32)
        h = jnp.tanh(pre)
        # (Bp, H) x (O, H) contracting over H -> (Bp, O); lane-dense rhs.
        out_acc = out_acc + lax.dot_general(
            h, wout_r_ref[t],
            dimension_numbers=(((1,), (1,)), ((), ())),
            preferred_element_type=jnp.float32)

    # (3) Single store of the accumulated Linear output + bias.
    out_ref[...] = (out_acc + bout_ref[...]).astype(out_ref.dtype)
    hT_ref[0] = h.astype(hT_ref.dtype)


def rnn2_forward(x, h0, w_ih, w_hh, b_ih, b_hh, w_out, b_out):
    """x: (T, B, I), h0: (1, B, H). Returns (output (B, O), hidden (1, B, H))."""
    Tn, B, I = x.shape
    H = w_hh.shape[0]
    O = w_out.shape[0]
    assert Tn == T, "RNN2.forward hard-codes 25 timesteps"
    assert w_out.shape[1] == T * H

    # Pad batch to a full 8-row sublane tile so all per-step slices are aligned.
    Bp = ((B + 7) // 8) * 8
    pad = Bp - B
    if pad:
        x_p = jnp.pad(x, ((0, 0), (0, pad), (0, 0)))
        h0_p = jnp.pad(h0, ((0, 0), (0, pad), (0, 0)))
    else:
        x_p, h0_p = x, h0

    # Wrapper-side weight prep (trace-time, tiny arrays):
    x2d = x_p.reshape(T * Bp, I)                       # time-major flatten
    wih_t = jnp.transpose(w_ih)                        # (I, H)
    whh_t = jnp.transpose(w_hh)                        # (H, H)
    bias = (b_ih + b_hh).reshape(1, H)                 # folded bias
    wout_r = w_out.reshape(O, T, H).transpose(1, 0, 2)  # (T, O, H) lane-dense
    bout = b_out.reshape(1, O)

    vmem = pltpu.MemorySpace.VMEM
    out_p, hT_p = pl.pallas_call(
        rnn2_kernel,
        out_shape=(jax.ShapeDtypeStruct((Bp, O), x.dtype),
                   jax.ShapeDtypeStruct((1, Bp, H), x.dtype)),
        in_specs=[pl.BlockSpec(memory_space=vmem)] * 7,
        out_specs=(pl.BlockSpec(memory_space=vmem),
                   pl.BlockSpec(memory_space=vmem)),
        scratch_shapes=[pltpu.VMEM((T, Bp, H), jnp.float32)],
    )(x2d, h0_p, wih_t, whh_t, bias, wout_r, bout)

    return out_p[:B], hT_p[:, :B]


def rnn2_reference(x, h0, w_ih, w_hh, b_ih, b_hh, w_out, b_out):
    """Pure-JAX reference matching PyTorch nn.RNN + the forward cat/Linear."""
    h = h0[0]
    outs = []
    for t in range(x.shape[0]):
        h = jnp.tanh(x[t] @ w_ih.T + b_ih + h @ w_hh.T + b_hh)
        outs.append(h)
    output2 = jnp.concatenate(outs, axis=-1)          # (B, T*H)
    output = output2 @ w_out.T + b_out
    return output, h[None]


if __name__ == "__main__":
    # Small, module-consistent shapes. seq_len must be 25 (forward concatenates
    # output1[0..24]).
    B, I, H, O = 4, 16, 32, 8

    key = jax.random.PRNGKey(0)
    ks = jax.random.split(key, 8)
    scale = 1.0 / np.sqrt(H)
    x = jax.random.normal(ks[0], (T, B, I), dtype=jnp.float32)
    h0 = jax.random.normal(ks[1], (1, B, H), dtype=jnp.float32)
    w_ih = jax.random.uniform(ks[2], (H, I), minval=-scale, maxval=scale)
    w_hh = jax.random.uniform(ks[3], (H, H), minval=-scale, maxval=scale)
    b_ih = jax.random.uniform(ks[4], (H,), minval=-scale, maxval=scale)
    b_hh = jax.random.uniform(ks[5], (H,), minval=-scale, maxval=scale)
    lin_scale = 1.0 / np.sqrt(T * H)
    w_out = jax.random.uniform(ks[6], (O, T * H), minval=-lin_scale, maxval=lin_scale)
    b_out = jax.random.uniform(ks[7], (O,), minval=-lin_scale, maxval=lin_scale)

    out, hT = rnn2_forward(x, h0, w_ih, w_hh, b_ih, b_hh, w_out, b_out)
    jax.block_until_ready((out, hT))

    ref_out, ref_hT = rnn2_reference(x, h0, w_ih, w_hh, b_ih, b_hh, w_out, b_out)
    np.testing.assert_allclose(np.asarray(out), np.asarray(ref_out), rtol=2e-5, atol=2e-5)
    np.testing.assert_allclose(np.asarray(hT), np.asarray(ref_hT), rtol=2e-5, atol=2e-5)

    print("KERNEL_OK")
</pallas_src>

<mosaic_0001>
module attributes {stable_mosaic.version = 11 : i64} {
  func.func @rnn2_kernel(%arg0: memref<200x16xf32, #tpu.memory_space<vmem>>, %arg1: memref<1x8x32xf32, #tpu.memory_space<vmem>>, %arg2: memref<16x32xf32, #tpu.memory_space<vmem>>, %arg3: memref<32x32xf32, #tpu.memory_space<vmem>>, %arg4: memref<1x32xf32, #tpu.memory_space<vmem>>, %arg5: memref<25x8x32xf32, #tpu.memory_space<vmem>>, %arg6: memref<1x8xf32, #tpu.memory_space<vmem>>, %arg7: memref<8x8xf32, #tpu.memory_space<vmem>>, %arg8: memref<1x8x32xf32, #tpu.memory_space<vmem>>, %arg9: memref<25x8x32xf32, #tpu.memory_space<vmem>>) attributes {dimension_semantics = [], scalar_prefetch = 0 : i64, scratch_operands = 1 : i64, tpu.core_type = #tpu.core_type<tc>} {
    %c0 = arith.constant 0 : index
    %c0_0 = arith.constant 0 : index
    %0 = vector.load %arg0[%c0, %c0_0] : memref<200x16xf32, #tpu.memory_space<vmem>>, vector<200x16xf32>
    %c0_1 = arith.constant 0 : index
    %c0_2 = arith.constant 0 : index
    %1 = vector.load %arg2[%c0_1, %c0_2] : memref<16x32xf32, #tpu.memory_space<vmem>>, vector<16x32xf32>
    %cst = arith.constant dense<0.000000e+00> : vector<200x32xf32>
    %2 = tpu.matmul %0, %1, %cst {dimension_numbers = #tpu.dot_dimension_numbers<[1], [0], [0], [1], [0, 0, 1, 1], [], []>} : vector<200x16xf32>, vector<16x32xf32>, vector<200x32xf32> -> vector<200x32xf32>
    %c0_3 = arith.constant 0 : index
    %c0_4 = arith.constant 0 : index
    %3 = vector.load %arg4[%c0_3, %c0_4] : memref<1x32xf32, #tpu.memory_space<vmem>>, vector<1x32xf32>
    %4 = vector.broadcast %3 : vector<1x32xf32> to vector<200x32xf32>
    %5 = arith.addf %2, %4 : vector<200x32xf32>
    %6 = vector.shape_cast %5 : vector<200x32xf32> to vector<25x8x32xf32>
    %c0_5 = arith.constant 0 : index
    %c0_6 = arith.constant 0 : index
    %c0_7 = arith.constant 0 : index
    %7 = vector.load %arg9[%c0_5, %c0_6, %c0_7] : memref<25x8x32xf32, #tpu.memory_space<vmem>>, vector<25x8x32xf32>
    tpu.vector_store %arg9[%c0_5, %c0_6, %c0_7], %6 {strides = array<i32>} : memref<25x8x32xf32, #tpu.memory_space<vmem>>, vector<25x8x32xf32>,
    %c0_8 = arith.constant 0 : index
    %c0_9 = arith.constant 0 : index
    %8 = vector.load %arg3[%c0_8, %c0_9] : memref<32x32xf32, #tpu.memory_space<vmem>>, vector<32x32xf32>
    %c0_10 = arith.constant 0 : index
    %c0_11 = arith.constant 0 : index
    %c0_12 = arith.constant 0 : index
    %9 = vector.load %arg1[%c0_10, %c0_11, %c0_12] : memref<1x8x32xf32, #tpu.memory_space<vmem>>, vector<1x8x32xf32>
    %10 = vector.shape_cast %9 : vector<1x8x32xf32> to vector<8x32xf32>
    %cst_13 = arith.constant 0.000000e+00 : f32
    %11 = vector.broadcast %cst_13 : f32 to vector<8x8xf32>
    %c0_14 = arith.constant 0 : index
    %c0_15 = arith.constant 0 : index
    %c0_16 = arith.constant 0 : index
    %12 = vector.load %arg9[%c0_14, %c0_15, %c0_16] : memref<25x8x32xf32, #tpu.memory_space<vmem>>, vector<1x8x32xf32>
    %13 = vector.shape_cast %12 : vector<1x8x32xf32> to vector<8x32xf32>
    %cst_17 = arith.constant dense<0.000000e+00> : vector<8x32xf32>
    %14 = tpu.matmul %10, %8, %cst_17 {dimension_numbers = #tpu.dot_dimension_numbers<[1], [0], [0], [1], [0, 0, 1, 1], [], []>} : vector<8x32xf32>, vector<32x32xf32>, vector<8x32xf32> -> vector<8x32xf32>
    %15 = arith.addf %13, %14 : vector<8x32xf32>
    %16 = math.tanh %15 : vector<8x32xf32>
    %c0_18 = arith.constant 0 : index
    %c0_19 = arith.constant 0 : index
    %c0_20 = arith.constant 0 : index
    %17 = vector.load %arg5[%c0_18, %c0_19, %c0_20] : memref<25x8x32xf32, #tpu.memory_space<vmem>>, vector<1x8x32xf32>
    %18 = vector.shape_cast %17 : vector<1x8x32xf32> to vector<8x32xf32>
    %cst_21 = arith.constant dense<0.000000e+00> : vector<8x8xf32>
    %19 = tpu.matmul %16, %18, %cst_21 {dimension_numbers = #tpu.dot_dimension_numbers<[1], [1], [0], [0], [0, 0, 1, 0], [], []>} : vector<8x32xf32>, vector<8x32xf32>, vector<8x8xf32> -> vector<8x8xf32>
    %20 = arith.addf %11, %19 : vector<8x8xf32>
    %c1 = arith.constant 1 : index
    %c0_22 = arith.constant 0 : index
    %c0_23 = arith.constant 0 : index
    %21 = vector.load %arg9[%c1, %c0_22, %c0_23] : memref<25x8x32xf32, #tpu.memory_space<vmem>>, vector<1x8x32xf32>
    %22 = vector.shape_cast %21 : vector<1x8x32xf32> to vector<8x32xf32>
    %cst_24 = arith.constant dense<0.000000e+00> : vector<8x32xf32>
    %23 = tpu.matmul %16, %8, %cst_24 {dimension_numbers = #tpu.dot_dimension_numbers<[1], [0], [0], [1], [0, 0, 1, 1], [], []>} : vector<8x32xf32>, vector<32x32xf32>, vector<8x32xf32> -> vector<8x32xf32>
    %24 = arith.addf %22, %23 : vector<8x32xf32>
    %25 = math.tanh %24 : vector<8x32xf32>
    %c1_25 = arith.constant 1 : index
    %c0_26 = arith.constant 0 : index
    %c0_27 = arith.constant 0 : index
    %26 = vector.load %arg5[%c1_25, %c0_26, %c0_27] : memref<25x8x32xf32, #tpu.memory_space<vmem>>, vector<1x8x32xf32>
    %27 = vector.shape_cast %26 : vector<1x8x32xf32> to vector<8x32xf32>
    %cst_28 = arith.constant dense<0.000000e+00> : vector<8x8xf32>
    %28 = tpu.matmul %25, %27, %cst_28 {dimension_numbers = #tpu.dot_dimension_numbers<[1], [1], [0], [0], [0, 0, 1, 0], [], []>} : vector<8x32xf32>, vector<8x32xf32>, vector<8x8xf32> -> vector<8x8xf32>
    %29 = arith.addf %20, %28 : vector<8x8xf32>
    %c2 = arith.constant 2 : index
    %c0_29 = arith.constant 0 : index
    %c0_30 = arith.constant 0 : index
    %30 = vector.load %arg9[%c2, %c0_29, %c0_30] : memref<25x8x32xf32, #tpu.memory_space<vmem>>, vector<1x8x32xf32>
    %31 = vector.shape_cast %30 : vector<1x8x32xf32> to vector<8x32xf32>
    %cst_31 = arith.constant dense<0.000000e+00> : vector<8x32xf32>
    %32 = tpu.matmul %25, %8, %cst_31 {dimension_numbers = #tpu.dot_dimension_numbers<[1], [0], [0], [1], [0, 0, 1, 1], [], []>} : vector<8x32xf32>, vector<32x32xf32>, vector<8x32xf32> -> vector<8x32xf32>
    %33 = arith.addf %31, %32 : vector<8x32xf32>
    %34 = math.tanh %33 : vector<8x32xf32>
    %c2_32 = arith.constant 2 : index
    %c0_33 = arith.constant 0 : index
    %c0_34 = arith.constant 0 : index
    %35 = vector.load %arg5[%c2_32, %c0_33, %c0_34] : memref<25x8x32xf32, #tpu.memory_space<vmem>>, vector<1x8x32xf32>
    %36 = vector.shape_cast %35 : vector<1x8x32xf32> to vector<8x32xf32>
    %cst_35 = arith.constant dense<0.000000e+00> : vector<8x8xf32>
    %37 = tpu.matmul %34, %36, %cst_35 {dimension_numbers = #tpu.dot_dimension_numbers<[1], [1], [0], [0], [0, 0, 1, 0], [], []>} : vector<8x32xf32>, vector<8x32xf32>, vector<8x8xf32> -> vector<8x8xf32>
    %38 = arith.addf %29, %37 : vector<8x8xf32>
    %c3 = arith.constant 3 : index
    %c0_36 = arith.constant 0 : index
    %c0_37 = arith.constant 0 : index
    %39 = vector.load %arg9[%c3, %c0_36, %c0_37] : memref<25x8x32xf32, #tpu.memory_space<vmem>>, vector<1x8x32xf32>
    %40 = vector.shape_cast %39 : vector<1x8x32xf32> to vector<8x32xf32>
    %cst_38 = arith.constant dense<0.000000e+00> : vector<8x32xf32>
    %41 = tpu.matmul %34, %8, %cst_38 {dimension_numbers = #tpu.dot_dimension_numbers<[1], [0], [0], [1], [0, 0, 1, 1], [], []>} : vector<8x32xf32>, vector<32x32xf32>, vector<8x32xf32> -> vector<8x32xf32>
    %42 = arith.addf %40, %41 : vector<8x32xf32>
    %43 = math.tanh %42 : vector<8x32xf32>
    %c3_39 = arith.constant 3 : index
    %c0_40 = arith.constant 0 : index
    %c0_41 = arith.constant 0 : index
    %44 = vector.load %arg5[%c3_39, %c0_40, %c0_41] : memref<25x8x32xf32, #tpu.memory_space<vmem>>, vector<1x8x32xf32>
    %45 = vector.shape_cast %44 : vector<1x8x32xf32> to vector<8x32xf32>
    %cst_42 = arith.constant dense<0.000000e+00> : vector<8x8xf32>
    %46 = tpu.matmul %43, %45, %cst_42 {dimension_numbers = #tpu.dot_dimension_numbers<[1], [1], [0], [0], [0, 0, 1, 0], [], []>} : vector<8x32xf32>, vector<8x32xf32>, vector<8x8xf32> -> vector<8x8xf32>
    %47 = arith.addf %38, %46 : vector<8x8xf32>
    %c4 = arith.constant 4 : index
    %c0_43 = arith.constant 0 : index
    %c0_44 = arith.constant 0 : index
    %48 = vector.load %arg9[%c4, %c0_43, %c0_44] : memref<25x8x32xf32, #tpu.memory_space<vmem>>, vector<1x8x32xf32>
    %49 = vector.shape_cast %48 : vector<1x8x32xf32> to vector<8x32xf32>
    %cst_45 = arith.constant dense<0.000000e+00> : vector<8x32xf32>
    %50 = tpu.matmul %43, %8, %cst_45 {dimension_numbers = #tpu.dot_dimension_numbers<[1], [0], [0], [1], [0, 0, 1, 1], [], []>} : vector<8x32xf32>, vector<32x32xf32>, vector<8x32xf32> -> vector<8x32xf32>
    %51 = arith.addf %49, %50 : vector<8x32xf32>
    %52 = math.tanh %51 : vector<8x32xf32>
    %c4_46 = arith.constant 4 : index
    %c0_47 = arith.constant 0 : index
    %c0_48 = arith.constant 0 : index
    %53 = vector.load %arg5[%c4_46, %c0_47, %c0_48] : memref<25x8x32xf32, #tpu.memory_space<vmem>>, vector<1x8x32xf32>
    %54 = vector.shape_cast %53 : vector<1x8x32xf32> to vector<8x32xf32>
    %cst_49 = arith.constant dense<0.000000e+00> : vector<8x8xf32>
    %55 = tpu.matmul %52, %54, %cst_49 {dimension_numbers = #tpu.dot_dimension_numbers<[1], [1], [0], [0], [0, 0, 1, 0], [], []>} : vector<8x32xf32>, vector<8x32xf32>, vector<8x8xf32> -> vector<8x8xf32>
    %56 = arith.addf %47, %55 : vector<8x8xf32>
    %c5 = arith.constant 5 : index
    %c0_50 = arith.constant 0 : index
    %c0_51 = arith.constant 0 : index
    %57 = vector.load %arg9[%c5, %c0_50, %c0_51] : memref<25x8x32xf32, #tpu.memory_space<vmem>>, vector<1x8x32xf32>
    %58 = vector.shape_cast %57 : vector<1x8x32xf32> to vector<8x32xf32>
    %cst_52 = arith.constant dense<0.000000e+00> : vector<8x32xf32>
    %59 = tpu.matmul %52, %8, %cst_52 {dimension_numbers = #tpu.dot_dimension_numbers<[1], [0], [0], [1], [0, 0, 1, 1], [], []>} : vector<8x32xf32>, vector<32x32xf32>, vector<8x32xf32> -> vector<8x32xf32>
    %60 = arith.addf %58, %59 : vector<8x32xf32>
    %61 = math.tanh %60 : vector<8x32xf32>
    %c5_53 = arith.constant 5 : index
    %c0_54 = arith.constant 0 : index
    %c0_55 = arith.constant 0 : index
    %62 = vector.load %arg5[%c5_53, %c0_54, %c0_55] : memref<25x8x32xf32, #tpu.memory_space<vmem>>, vector<1x8x32xf32>
    %63 = vector.shape_cast %62 : vector<1x8x32xf32> to vector<8x32xf32>
    %cst_56 = arith.constant dense<0.000000e+00> : vector<8x8xf32>
    %64 = tpu.matmul %61, %63, %cst_56 {dimension_numbers = #tpu.dot_dimension_numbers<[1], [1], [0], [0], [0, 0, 1, 0], [], []>} : vector<8x32xf32>, vector<8x32xf32>, vector<8x8xf32> -> vector<8x8xf32>
    %65 = arith.addf %56, %64 : vector<8x8xf32>
    %c6 = arith.constant 6 : index
    %c0_57 = arith.constant 0 : index
    %c0_58 = arith.constant 0 : index
    %66 = vector.load %arg9[%c6, %c0_57, %c0_58] : memref<25x8x32xf32, #tpu.memory_space<vmem>>, vector<1x8x32xf32>
    %67 = vector.shape_cast %66 : vector<1x8x32xf32> to vector<8x32xf32>
    %cst_59 = arith.constant dense<0.000000e+00> : vector<8x32xf32>
    %68 = tpu.matmul %61, %8, %cst_59 {dimension_numbers = #tpu.dot_dimension_numbers<[1], [0], [0], [1], [0, 0, 1, 1], [], []>} : vector<8x32xf32>, vector<32x32xf32>, vector<8x32xf32> -> vector<8x32xf32>
    %69 = arith.addf %67, %68 : vector<8x32xf32>
    %70 = math.tanh %69 : vector<8x32xf32>
    %c6_60 = arith.constant 6 : index
    %c0_61 = arith.constant 0 : index
    %c0_62 = arith.constant 0 : index
    %71 = vector.load %arg5[%c6_60, %c0_61, %c0_62] : memref<25x8x32xf32, #tpu.memory_space<vmem>>, vector<1x8x32xf32>
    %72 = vector.shape_cast %71 : vector<1x8x32xf32> to vector<8x32xf32>
    %cst_63 = arith.constant dense<0.000000e+00> : vector<8x8xf32>
    %73 = tpu.matmul %70, %72, %cst_63 {dimension_numbers = #tpu.dot_dimension_numbers<[1], [1], [0], [0], [0, 0, 1, 0], [], []>} : vector<8x32xf32>, vector<8x32xf32>, vector<8x8xf32> -> vector<8x8xf32>
    %74 = arith.addf %65, %73 : vector<8x8xf32>
    %c7 = arith.constant 7 : index
    %c0_64 = arith.constant 0 : index
    %c0_65 = arith.constant 0 : index
    %75 = vector.load %arg9[%c7, %c0_64, %c0_65] : memref<25x8x32xf32, #tpu.memory_space<vmem>>, vector<1x8x32xf32>
    %76 = vector.shape_cast %75 : vector<1x8x32xf32> to vector<8x32xf32>
    %cst_66 = arith.constant dense<0.000000e+00> : vector<8x32xf32>
    %77 = tpu.matmul %70, %8, %cst_66 {dimension_numbers = #tpu.dot_dimension_numbers<[1], [0], [0], [1], [0, 0, 1, 1], [], []>} : vector<8x32xf32>, vector<32x32xf32>, vector<8x32xf32> -> vector<8x32xf32>
    %78 = arith.addf %76, %77 : vector<8x32xf32>
    %79 = math.tanh %78 : vector<8x32xf32>
    %c7_67 = arith.constant 7 : index
    %c0_68 = arith.constant 0 : index
    %c0_69 = arith.constant 0 : index
    %80 = vector.load %arg5[%c7_67, %c0_68, %c0_69] : memref<25x8x32xf32, #tpu.memory_space<vmem>>, vector<1x8x32xf32>
    %81 = vector.shape_cast %80 : vector<1x8x32xf32> to vector<8x32xf32>
    %cst_70 = arith.constant dense<0.000000e+00> : vector<8x8xf32>
    %82 = tpu.matmul %79, %81, %cst_70 {dimension_numbers = #tpu.dot_dimension_numbers<[1], [1], [0], [0], [0, 0, 1, 0], [], []>} : vector<8x32xf32>, vector<8x32xf32>, vector<8x8xf32> -> vector<8x8xf32>
    %83 = arith.addf %74, %82 : vector<8x8xf32>
    %c8 = arith.constant 8 : index
    %c0_71 = arith.constant 0 : index
    %c0_72 = arith.constant 0 : index
    %84 = vector.load %arg9[%c8, %c0_71, %c0_72] : memref<25x8x32xf32, #tpu.memory_space<vmem>>, vector<1x8x32xf32>
    %85 = vector.shape_cast %84 : vector<1x8x32xf32> to vector<8x32xf32>
    %cst_73 = arith.constant dense<0.000000e+00> : vector<8x32xf32>
    %86 = tpu.matmul %79, %8, %cst_73 {dimension_numbers = #tpu.dot_dimension_numbers<[1], [0], [0], [1], [0, 0, 1, 1], [], []>} : vector<8x32xf32>, vector<32x32xf32>, vector<8x32xf32> -> vector<8x32xf32>
    %87 = arith.addf %85, %86 : vector<8x32xf32>
    %88 = math.tanh %87 : vector<8x32xf32>
    %c8_74 = arith.constant 8 : index
    %c0_75 = arith.constant 0 : index
    %c0_76 = arith.constant 0 : index
    %89 = vector.load %arg5[%c8_74, %c0_75, %c0_76] : memref<25x8x32xf32, #tpu.memory_space<vmem>>, vector<1x8x32xf32>
    %90 = vector.shape_cast %89 : vector<1x8x32xf32> to vector<8x32xf32>
    %cst_77 = arith.constant dense<0.000000e+00> : vector<8x8xf32>
    %91 = tpu.matmul %88, %90, %cst_77 {dimension_numbers = #tpu.dot_dimension_numbers<[1], [1], [0], [0], [0, 0, 1, 0], [], []>} : vector<8x32xf32>, vector<8x32xf32>, vector<8x8xf32> -> vector<8x8xf32>
    %92 = arith.addf %83, %91 : vector<8x8xf32>
    %c9 = arith.constant 9 : index
    %c0_78 = arith.constant 0 : index
    %c0_79 = arith.constant 0 : index
    %93 = vector.load %arg9[%c9, %c0_78, %c0_79] : memref<25x8x32xf32, #tpu.memory_space<vmem>>, vector<1x8x32xf32>
    %94 = vector.shape_cast %93 : vector<1x8x32xf32> to vector<8x32xf32>
    %cst_80 = arith.constant dense<0.000000e+00> : vector<8x32xf32>
    %95 = tpu.matmul %88, %8, %cst_80 {dimension_numbers = #tpu.dot_dimension_numbers<[1], [0], [0], [1], [0, 0, 1, 1], [], []>} : vector<8x32xf32>, vector<32x32xf32>, vector<8x32xf32> -> vector<8x32xf32>
    %96 = arith.addf %94, %95 : vector<8x32xf32>
    %97 = math.tanh %96 : vector<8x32xf32>
    %c9_81 = arith.constant 9 : index
    %c0_82 = arith.constant 0 : index
    %c0_83 = arith.constant 0 : index
    %98 = vector.load %arg5[%c9_81, %c0_82, %c0_83] : memref<25x8x32xf32, #tpu.memory_space<vmem>>, vector<1x8x32xf32>
    %99 = vector.shape_cast %98 : vector<1x8x32xf32> to vector<8x32xf32>
    %cst_84 = arith.constant dense<0.000000e+00> : vector<8x8xf32>
    %100 = tpu.matmul %97, %99, %cst_84 {dimension_numbers = #tpu.dot_dimension_numbers<[1], [1], [0], [0], [0, 0, 1, 0], [], []>} : vector<8x32xf32>, vector<8x32xf32>, vector<8x8xf32> -> vector<8x8xf32>
    %101 = arith.addf %92, %100 : vector<8x8xf32>
    %c10 = arith.constant 10 : index
    %c0_85 = arith.constant 0 : index
    %c0_86 = arith.constant 0 : index
    %102 = vector.load %arg9[%c10, %c0_85, %c0_86] : memref<25x8x32xf32, #tpu.memory_space<vmem>>, vector<1x8x32xf32>
    %103 = vector.shape_cast %102 : vector<1x8x32xf32> to vector<8x32xf32>
    %cst_87 = arith.constant dense<0.000000e+00> : vector<8x32xf32>
    %104 = tpu.matmul %97, %8, %cst_87 {dimension_numbers = #tpu.dot_dimension_numbers<[1], [0], [0], [1], [0, 0, 1, 1], [], []>} : vector<8x32xf32>, vector<32x32xf32>, vector<8x32xf32> -> vector<8x32xf32>
    %105 = arith.addf %103, %104 : vector<8x32xf32>
    %106 = math.tanh %105 : vector<8x32xf32>
    %c10_88 = arith.constant 10 : index
    %c0_89 = arith.constant 0 : index
    %c0_90 = arith.constant 0 : index
    %107 = vector.load %arg5[%c10_88, %c0_89, %c0_90] : memref<25x8x32xf32, #tpu.memory_space<vmem>>, vector<1x8x32xf32>
    %108 = vector.shape_cast %107 : vector<1x8x32xf32> to vector<8x32xf32>
    %cst_91 = arith.constant dense<0.000000e+00> : vector<8x8xf32>
    %109 = tpu.matmul %106, %108, %cst_91 {dimension_numbers = #tpu.dot_dimension_numbers<[1], [1], [0], [0], [0, 0, 1, 0], [], []>} : vector<8x32xf32>, vector<8x32xf32>, vector<8x8xf32> -> vector<8x8xf32>
    %110 = arith.addf %101, %109 : vector<8x8xf32>
    %c11 = arith.constant 11 : index
    %c0_92 = arith.constant 0 : index
    %c0_93 = arith.constant 0 : index
    %111 = vector.load %arg9[%c11, %c0_92, %c0_93] : memref<25x8x32xf32, #tpu.memory_space<vmem>>, vector<1x8x32xf32>
    %112 = vector.shape_cast %111 : vector<1x8x32xf32> to vector<8x32xf32>
    %cst_94 = arith.constant dense<0.000000e+00> : vector<8x32xf32>
    %113 = tpu.matmul %106, %8, %cst_94 {dimension_numbers = #tpu.dot_dimension_numbers<[1], [0], [0], [1], [0, 0, 1, 1], [], []>} : vector<8x32xf32>, vector<32x32xf32>, vector<8x32xf32> -> vector<8x32xf32>
    %114 = arith.addf %112, %113 : vector<8x32xf32>
    %115 = math.tanh %114 : vector<8x32xf32>
    %c11_95 = arith.constant 11 : index
    %c0_96 = arith.constant 0 : index
    %c0_97 = arith.constant 0 : index
    %116 = vector.load %arg5[%c11_95, %c0_96, %c0_97] : memref<25x8x32xf32, #tpu.memory_space<vmem>>, vector<1x8x32xf32>
    %117 = vector.shape_cast %116 : vector<1x8x32xf32> to vector<8x32xf32>
    %cst_98 = arith.constant dense<0.000000e+00> : vector<8x8xf32>
    %118 = tpu.matmul %115, %117, %cst_98 {dimension_numbers = #tpu.dot_dimension_numbers<[1], [1], [0], [0], [0, 0, 1, 0], [], []>} : vector<8x32xf32>, vector<8x32xf32>, vector<8x8xf32> -> vector<8x8xf32>
    %119 = arith.addf %110, %118 : vector<8x8xf32>
    %c12 = arith.constant 12 : index
    %c0_99 = arith.constant 0 : index
    %c0_100 = arith.constant 0 : index
    %120 = vector.load %arg9[%c12, %c0_99, %c0_100] : memref<25x8x32xf32, #tpu.memory_space<vmem>>, vector<1x8x32xf32>
    %121 = vector.shape_cast %120 : vector<1x8x32xf32> to vector<8x32xf32>
    %cst_101 = arith.constant dense<0.000000e+00> : vector<8x32xf32>
    %122 = tpu.matmul %115, %8, %cst_101 {dimension_numbers = #tpu.dot_dimension_numbers<[1], [0], [0], [1], [0, 0, 1, 1], [], []>} : vector<8x32xf32>, vector<32x32xf32>, vector<8x32xf32> -> vector<8x32xf32>
    %123 = arith.addf %121, %122 : vector<8x32xf32>
    %124 = math.tanh %123 : vector<8x32xf32>
    %c12_102 = arith.constant 12 : index
    %c0_103 = arith.constant 0 : index
    %c0_104 = arith.constant 0 : index
    %125 = vector.load %arg5[%c12_102, %c0_103, %c0_104] : memref<25x8x32xf32, #tpu.memory_space<vmem>>, vector<1x8x32xf32>
    %126 = vector.shape_cast %125 : vector<1x8x32xf32> to vector<8x32xf32>
    %cst_105 = arith.constant dense<0.000000e+00> : vector<8x8xf32>
    %127 = tpu.matmul %124, %126, %cst_105 {dimension_numbers = #tpu.dot_dimension_numbers<[1], [1], [0], [0], [0, 0, 1, 0], [], []>} : vector<8x32xf32>, vector<8x32xf32>, vector<8x8xf32> -> vector<8x8xf32>
    %128 = arith.addf %119, %127 : vector<8x8xf32>
    %c13 = arith.constant 13 : index
    %c0_106 = arith.constant 0 : index
    %c0_107 = arith.constant 0 : index
    %129 = vector.load %arg9[%c13, %c0_106, %c0_107] : memref<25x8x32xf32, #tpu.memory_space<vmem>>, vector<1x8x32xf32>
    %130 = vector.shape_cast %129 : vector<1x8x32xf32> to vector<8x32xf32>
    %cst_108 = arith.constant dense<0.000000e+00> : vector<8x32xf32>
    %131 = tpu.matmul %124, %8, %cst_108 {dimension_numbers = #tpu.dot_dimension_numbers<[1], [0], [0], [1], [0, 0, 1, 1], [], []>} : vector<8x32xf32>, vector<32x32xf32>, vector<8x32xf32> -> vector<8x32xf32>
    %132 = arith.addf %130, %131 : vector<8x32xf32>
    %133 = math.tanh %132 : vector<8x32xf32>
    %c13_109 = arith.constant 13 : index
    %c0_110 = arith.constant 0 : index
    %c0_111 = arith.constant 0 : index
    %134 = vector.load %arg5[%c13_109, %c0_110, %c0_111] : memref<25x8x32xf32, #tpu.memory_space<vmem>>, vector<1x8x32xf32>
    %135 = vector.shape_cast %134 : vector<1x8x32xf32> to vector<8x32xf32>
    %cst_112 = arith.constant dense<0.000000e+00> : vector<8x8xf32>
    %136 = tpu.matmul %133, %135, %cst_112 {dimension_numbers = #tpu.dot_dimension_numbers<[1], [1], [0], [0], [0, 0, 1, 0], [], []>} : vector<8x32xf32>, vector<8x32xf32>, vector<8x8xf32> -> vector<8x8xf32>
    %137 = arith.addf %128, %136 : vector<8x8xf32>
    %c14 = arith.constant 14 : index
    %c0_113 = arith.constant 0 : index
    %c0_114 = arith.constant 0 : index
    %138 = vector.load %arg9[%c14, %c0_113, %c0_114] : memref<25x8x32xf32, #tpu.memory_space<vmem>>, vector<1x8x32xf32>
    %139 = vector.shape_cast %138 : vector<1x8x32xf32> to vector<8x32xf32>
    %cst_115 = arith.constant dense<0.000000e+00> : vector<8x32xf32>
    %140 = tpu.matmul %133, %8, %cst_115 {dimension_numbers = #tpu.dot_dimension_numbers<[1], [0], [0], [1], [0, 0, 1, 1], [], []>} : vector<8x32xf32>, vector<32x32xf32>, vector<8x32xf32> -> vector<8x32xf32>
    %141 = arith.addf %139, %140 : vector<8x32xf32>
    %142 = math.tanh %141 : vector<8x32xf32>
    %c14_116 = arith.constant 14 : index
    %c0_117 = arith.constant 0 : index
    %c0_118 = arith.constant 0 : index
    %143 = vector.load %arg5[%c14_116, %c0_117, %c0_118] : memref<25x8x32xf32, #tpu.memory_space<vmem>>, vector<1x8x32xf32>
    %144 = vector.shape_cast %143 : vector<1x8x32xf32> to vector<8x32xf32>
    %cst_119 = arith.constant dense<0.000000e+00> : vector<8x8xf32>
    %145 = tpu.matmul %142, %144, %cst_119 {dimension_numbers = #tpu.dot_dimension_numbers<[1], [1], [0], [0], [0, 0, 1, 0], [], []>} : vector<8x32xf32>, vector<8x32xf32>, vector<8x8xf32> -> vector<8x8xf32>
    %146 = arith.addf %137, %145 : vector<8x8xf32>
    %c15 = arith.constant 15 : index
    %c0_120 = arith.constant 0 : index
    %c0_121 = arith.constant 0 : index
    %147 = vector.load %arg9[%c15, %c0_120, %c0_121] : memref<25x8x32xf32, #tpu.memory_space<vmem>>, vector<1x8x32xf32>
    %148 = vector.shape_cast %147 : vector<1x8x32xf32> to vector<8x32xf32>
    %cst_122 = arith.constant dense<0.000000e+00> : vector<8x32xf32>
    %149 = tpu.matmul %142, %8, %cst_122 {dimension_numbers = #tpu.dot_dimension_numbers<[1], [0], [0], [1], [0, 0, 1, 1], [], []>} : vector<8x32xf32>, vector<32x32xf32>, vector<8x32xf32> -> vector<8x32xf32>
    %150 = arith.addf %148, %149 : vector<8x32xf32>
    %151 = math.tanh %150 : vector<8x32xf32>
    %c15_123 = arith.constant 15 : index
    %c0_124 = arith.constant 0 : index
    %c0_125 = arith.constant 0 : index
    %152 = vector.load %arg5[%c15_123, %c0_124, %c0_125] : memref<25x8x32xf32, #tpu.memory_space<vmem>>, vector<1x8x32xf32>
    %153 = vector.shape_cast %152 : vector<1x8x32xf32> to vector<8x32xf32>
    %cst_126 = arith.constant dense<0.000000e+00> : vector<8x8xf32>
    %154 = tpu.matmul %151, %153, %cst_126 {dimension_numbers = #tpu.dot_dimension_numbers<[1], [1], [0], [0], [0, 0, 1, 0], [], []>} : vector<8x32xf32>, vector<8x32xf32>, vector<8x8xf32> -> vector<8x8xf32>
    %155 = arith.addf %146, %154 : vector<8x8xf32>
    %c16 = arith.constant 16 : index
    %c0_127 = arith.constant 0 : index
    %c0_128 = arith.constant 0 : index
    %156 = vector.load %arg9[%c16, %c0_127, %c0_128] : memref<25x8x32xf32, #tpu.memory_space<vmem>>, vector<1x8x32xf32>
    %157 = vector.shape_cast %156 : vector<1x8x32xf32> to vector<8x32xf32>
    %cst_129 = arith.constant dense<0.000000e+00> : vector<8x32xf32>
    %158 = tpu.matmul %151, %8, %cst_129 {dimension_numbers = #tpu.dot_dimension_numbers<[1], [0], [0], [1], [0, 0, 1, 1], [], []>} : vector<8x32xf32>, vector<32x32xf32>, vector<8x32xf32> -> vector<8x32xf32>
    %159 = arith.addf %157, %158 : vector<8x32xf32>
    %160 = math.tanh %159 : vector<8x32xf32>
    %c16_130 = arith.constant 16 : index
    %c0_131 = arith.constant 0 : index
    %c0_132 = arith.constant 0 : index
    %161 = vector.load %arg5[%c16_130, %c0_131, %c0_132] : memref<25x8x32xf32, #tpu.memory_space<vmem>>, vector<1x8x32xf32>
    %162 = vector.shape_cast %161 : vector<1x8x32xf32> to vector<8x32xf32>
    %cst_133 = arith.constant dense<0.000000e+00> : vector<8x8xf32>
    %163 = tpu.matmul %160, %162, %cst_133 {dimension_numbers = #tpu.dot_dimension_numbers<[1], [1], [0], [0], [0, 0, 1, 0], [], []>} : vector<8x32xf32>, vector<8x32xf32>, vector<8x8xf32> -> vector<8x8xf32>
    %164 = arith.addf %155, %163 : vector<8x8xf32>
    %c17 = arith.constant 17 : index
    %c0_134 = arith.constant 0 : index
    %c0_135 = arith.constant 0 : index
    %165 = vector.load %arg9[%c17, %c0_134, %c0_135] : memref<25x8x32xf32, #tpu.memory_space<vmem>>, vector<1x8x32xf32>
    %166 = vector.shape_cast %165 : vector<1x8x32xf32> to vector<8x32xf32>
    %cst_136 = arith.constant dense<0.000000e+00> : vector<8x32xf32>
    %167 = tpu.matmul %160, %8, %cst_136 {dimension_numbers = #tpu.dot_dimension_numbers<[1], [0], [0], [1], [0, 0, 1, 1], [], []>} : vector<8x32xf32>, vector<32x32xf32>, vector<8x32xf32> -> vector<8x32xf32>
    %168 = arith.addf %166, %167 : vector<8x32xf32>
    %169 = math.tanh %168 : vector<8x32xf32>
    %c17_137 = arith.constant 17 : index
    %c0_138 = arith.constant 0 : index
    %c0_139 = arith.constant 0 : index
    %170 = vector.load %arg5[%c17_137, %c0_138, %c0_139] : memref<25x8x32xf32, #tpu.memory_space<vmem>>, vector<1x8x32xf32>
    %171 = vector.shape_cast %170 : vector<1x8x32xf32> to vector<8x32xf32>
    %cst_140 = arith.constant dense<0.000000e+00> : vector<8x8xf32>
    %172 = tpu.matmul %169, %171, %cst_140 {dimension_numbers = #tpu.dot_dimension_numbers<[1], [1], [0], [0], [0, 0, 1, 0], [], []>} : vector<8x32xf32>, vector<8x32xf32>, vector<8x8xf32> -> vector<8x8xf32>
    %173 = arith.addf %164, %172 : vector<8x8xf32>
    %c18 = arith.constant 18 : index
    %c0_141 = arith.constant 0 : index
    %c0_142 = arith.constant 0 : index
    %174 = vector.load %arg9[%c18, %c0_141, %c0_142] : memref<25x8x32xf32, #tpu.memory_space<vmem>>, vector<1x8x32xf32>
    %175 = vector.shape_cast %174 : vector<1x8x32xf32> to vector<8x32xf32>
    %cst_143 = arith.constant dense<0.000000e+00> : vector<8x32xf32>
    %176 = tpu.matmul %169, %8, %cst_143 {dimension_numbers = #tpu.dot_dimension_numbers<[1], [0], [0], [1], [0, 0, 1, 1], [], []>} : vector<8x32xf32>, vector<32x32xf32>, vector<8x32xf32> -> vector<8x32xf32>
    %177 = arith.addf %175, %176 : vector<8x32xf32>
    %178 = math.tanh %177 : vector<8x32xf32>
    %c18_144 = arith.constant 18 : index
    %c0_145 = arith.constant 0 : index
    %c0_146 = arith.constant 0 : index
    %179 = vector.load %arg5[%c18_144, %c0_145, %c0_146] : memref<25x8x32xf32, #tpu.memory_space<vmem>>, vector<1x8x32xf32>
    %180 = vector.shape_cast %179 : vector<1x8x32xf32> to vector<8x32xf32>
    %cst_147 = arith.constant dense<0.000000e+00> : vector<8x8xf32>
    %181 = tpu.matmul %178, %180, %cst_147 {dimension_numbers = #tpu.dot_dimension_numbers<[1], [1], [0], [0], [0, 0, 1, 0], [], []>} : vector<8x32xf32>, vector<8x32xf32>, vector<8x8xf32> -> vector<8x8xf32>
    %182 = arith.addf %173, %181 : vector<8x8xf32>
    %c19 = arith.constant 19 : index
    %c0_148 = arith.constant 0 : index
    %c0_149 = arith.constant 0 : index
    %183 = vector.load %arg9[%c19, %c0_148, %c0_149] : memref<25x8x32xf32, #tpu.memory_space<vmem>>, vector<1x8x32xf32>
    %184 = vector.shape_cast %183 : vector<1x8x32xf32> to vector<8x32xf32>
    %cst_150 = arith.constant dense<0.000000e+00> : vector<8x32xf32>
    %185 = tpu.matmul %178, %8, %cst_150 {dimension_numbers = #tpu.dot_dimension_numbers<[1], [0], [0], [1], [0, 0, 1, 1], [], []>} : vector<8x32xf32>, vector<32x32xf32>, vector<8x32xf32> -> vector<8x32xf32>
    %186 = arith.addf %184, %185 : vector<8x32xf32>
    %187 = math.tanh %186 : vector<8x32xf32>
    %c19_151 = arith.constant 19 : index
    %c0_152 = arith.constant 0 : index
    %c0_153 = arith.constant 0 : index
    %188 = vector.load %arg5[%c19_151, %c0_152, %c0_153] : memref<25x8x32xf32, #tpu.memory_space<vmem>>, vector<1x8x32xf32>
    %189 = vector.shape_cast %188 : vector<1x8x32xf32> to vector<8x32xf32>
    %cst_154 = arith.constant dense<0.000000e+00> : vector<8x8xf32>
    %190 = tpu.matmul %187, %189, %cst_154 {dimension_numbers = #tpu.dot_dimension_numbers<[1], [1], [0], [0], [0, 0, 1, 0], [], []>} : vector<8x32xf32>, vector<8x32xf32>, vector<8x8xf32> -> vector<8x8xf32>
    %191 = arith.addf %182, %190 : vector<8x8xf32>
    %c20 = arith.constant 20 : index
    %c0_155 = arith.constant 0 : index
    %c0_156 = arith.constant 0 : index
    %192 = vector.load %arg9[%c20, %c0_155, %c0_156] : memref<25x8x32xf32, #tpu.memory_space<vmem>>, vector<1x8x32xf32>
    %193 = vector.shape_cast %192 : vector<1x8x32xf32> to vector<8x32xf32>
    %cst_157 = arith.constant dense<0.000000e+00> : vector<8x32xf32>
    %194 = tpu.matmul %187, %8, %cst_157 {dimension_numbers = #tpu.dot_dimension_numbers<[1], [0], [0], [1], [0, 0, 1, 1], [], []>} : vector<8x32xf32>, vector<32x32xf32>, vector<8x32xf32> -> vector<8x32xf32>
    %195 = arith.addf %193, %194 : vector<8x32xf32>
    %196 = math.tanh %195 : vector<8x32xf32>
    %c20_158 = arith.constant 20 : index
    %c0_159 = arith.constant 0 : index
    %c0_160 = arith.constant 0 : index
    %197 = vector.load %arg5[%c20_158, %c0_159, %c0_160] : memref<25x8x32xf32, #tpu.memory_space<vmem>>, vector<1x8x32xf32>
    %198 = vector.shape_cast %197 : vector<1x8x32xf32> to vector<8x32xf32>
    %cst_161 = arith.constant dense<0.000000e+00> : vector<8x8xf32>
    %199 = tpu.matmul %196, %198, %cst_161 {dimension_numbers = #tpu.dot_dimension_numbers<[1], [1], [0], [0], [0, 0, 1, 0], [], []>} : vector<8x32xf32>, vector<8x32xf32>, vector<8x8xf32> -> vector<8x8xf32>
    %200 = arith.addf %191, %199 : vector<8x8xf32>
    %c21 = arith.constant 21 : index
    %c0_162 = arith.constant 0 : index
    %c0_163 = arith.constant 0 : index
    %201 = vector.load %arg9[%c21, %c0_162, %c0_163] : memref<25x8x32xf32, #tpu.memory_space<vmem>>, vector<1x8x32xf32>
    %202 = vector.shape_cast %201 : vector<1x8x32xf32> to vector<8x32xf32>
    %cst_164 = arith.constant dense<0.000000e+00> : vector<8x32xf32>
    %203 = tpu.matmul %196, %8, %cst_164 {dimension_numbers = #tpu.dot_dimension_numbers<[1], [0], [0], [1], [0, 0, 1, 1], [], []>} : vector<8x32xf32>, vector<32x32xf32>, vector<8x32xf32> -> vector<8x32xf32>
    %204 = arith.addf %202, %203 : vector<8x32xf32>
    %205 = math.tanh %204 : vector<8x32xf32>
    %c21_165 = arith.constant 21 : index
    %c0_166 = arith.constant 0 : index
    %c0_167 = arith.constant 0 : index
    %206 = vector.load %arg5[%c21_165, %c0_166, %c0_167] : memref<25x8x32xf32, #tpu.memory_space<vmem>>, vector<1x8x32xf32>
    %207 = vector.shape_cast %206 : vector<1x8x32xf32> to vector<8x32xf32>
    %cst_168 = arith.constant dense<0.000000e+00> : vector<8x8xf32>
    %208 = tpu.matmul %205, %207, %cst_168 {dimension_numbers = #tpu.dot_dimension_numbers<[1], [1], [0], [0], [0, 0, 1, 0], [], []>} : vector<8x32xf32>, vector<8x32xf32>, vector<8x8xf32> -> vector<8x8xf32>
    %209 = arith.addf %200, %208 : vector<8x8xf32>
    %c22 = arith.constant 22 : index
    %c0_169 = arith.constant 0 : index
    %c0_170 = arith.constant 0 : index
    %210 = vector.load %arg9[%c22, %c0_169, %c0_170] : memref<25x8x32xf32, #tpu.memory_space<vmem>>, vector<1x8x32xf32>
    %211 = vector.shape_cast %210 : vector<1x8x32xf32> to vector<8x32xf32>
    %cst_171 = arith.constant dense<0.000000e+00> : vector<8x32xf32>
    %212 = tpu.matmul %205, %8, %cst_171 {dimension_numbers = #tpu.dot_dimension_numbers<[1], [0], [0], [1], [0, 0, 1, 1], [], []>} : vector<8x32xf32>, vector<32x32xf32>, vector<8x32xf32> -> vector<8x32xf32>
    %213 = arith.addf %211, %212 : vector<8x32xf32>
    %214 = math.tanh %213 : vector<8x32xf32>
    %c22_172 = arith.constant 22 : index
    %c0_173 = arith.constant 0 : index
    %c0_174 = arith.constant 0 : index
    %215 = vector.load %arg5[%c22_172, %c0_173, %c0_174] : memref<25x8x32xf32, #tpu.memory_space<vmem>>, vector<1x8x32xf32>
    %216 = vector.shape_cast %215 : vector<1x8x32xf32> to vector<8x32xf32>
    %cst_175 = arith.constant dense<0.000000e+00> : vector<8x8xf32>
    %217 = tpu.matmul %214, %216, %cst_175 {dimension_numbers = #tpu.dot_dimension_numbers<[1], [1], [0], [0], [0, 0, 1, 0], [], []>} : vector<8x32xf32>, vector<8x32xf32>, vector<8x8xf32> -> vector<8x8xf32>
    %218 = arith.addf %209, %217 : vector<8x8xf32>
    %c23 = arith.constant 23 : index
    %c0_176 = arith.constant 0 : index
    %c0_177 = arith.constant 0 : index
    %219 = vector.load %arg9[%c23, %c0_176, %c0_177] : memref<25x8x32xf32, #tpu.memory_space<vmem>>, vector<1x8x32xf32>
    %220 = vector.shape_cast %219 : vector<1x8x32xf32> to vector<8x32xf32>
    %cst_178 = arith.constant dense<0.000000e+00> : vector<8x32xf32>
    %221 = tpu.matmul %214, %8, %cst_178 {dimension_numbers = #tpu.dot_dimension_numbers<[1], [0], [0], [1], [0, 0, 1, 1], [], []>} : vector<8x32xf32>, vector<32x32xf32>, vector<8x32xf32> -> vector<8x32xf32>
    %222 = arith.addf %220, %221 : vector<8x32xf32>
    %223 = math.tanh %222 : vector<8x32xf32>
    %c23_179 = arith.constant 23 : index
    %c0_180 = arith.constant 0 : index
    %c0_181 = arith.constant 0 : index
    %224 = vector.load %arg5[%c23_179, %c0_180, %c0_181] : memref<25x8x32xf32, #tpu.memory_space<vmem>>, vector<1x8x32xf32>
    %225 = vector.shape_cast %224 : vector<1x8x32xf32> to vector<8x32xf32>
    %cst_182 = arith.constant dense<0.000000e+00> : vector<8x8xf32>
    %226 = tpu.matmul %223, %225, %cst_182 {dimension_numbers = #tpu.dot_dimension_numbers<[1], [1], [0], [0], [0, 0, 1, 0], [], []>} : vector<8x32xf32>, vector<8x32xf32>, vector<8x8xf32> -> vector<8x8xf32>
    %227 = arith.addf %218, %226 : vector<8x8xf32>
    %c24 = arith.constant 24 : index
    %c0_183 = arith.constant 0 : index
    %c0_184 = arith.constant 0 : index
    %228 = vector.load %arg9[%c24, %c0_183, %c0_184] : memref<25x8x32xf32, #tpu.memory_space<vmem>>, vector<1x8x32xf32>
    %229 = vector.shape_cast %228 : vector<1x8x32xf32> to vector<8x32xf32>
    %cst_185 = arith.constant dense<0.000000e+00> : vector<8x32xf32>
    %230 = tpu.matmul %223, %8, %cst_185 {dimension_numbers = #tpu.dot_dimension_numbers<[1], [0], [0], [1], [0, 0, 1, 1], [], []>} : vector<8x32xf32>, vector<32x32xf32>, vector<8x32xf32> -> vector<8x32xf32>
    %231 = arith.addf %229, %230 : vector<8x32xf32>
    %232 = math.tanh %231 : vector<8x32xf32>
    %c24_186 = arith.constant 24 : index
    %c0_187 = arith.constant 0 : index
    %c0_188 = arith.constant 0 : index
    %233 = vector.load %arg5[%c24_186, %c0_187, %c0_188] : memref<25x8x32xf32, #tpu.memory_space<vmem>>, vector<1x8x32xf32>
    %234 = vector.shape_cast %233 : vector<1x8x32xf32> to vector<8x32xf32>
    %cst_189 = arith.constant dense<0.000000e+00> : vector<8x8xf32>
    %235 = tpu.matmul %232, %234, %cst_189 {dimension_numbers = #tpu.dot_dimension_numbers<[1], [1], [0], [0], [0, 0, 1, 0], [], []>} : vector<8x32xf32>, vector<8x32xf32>, vector<8x8xf32> -> vector<8x8xf32>
    %236 = arith.addf %227, %235 : vector<8x8xf32>
    %c0_190 = arith.constant 0 : index
    %c0_191 = arith.constant 0 : index
    %237 = vector.load %arg6[%c0_190, %c0_191] : memref<1x8xf32, #tpu.memory_space<vmem>>, vector<1x8xf32>
    %238 = vector.broadcast %237 : vector<1x8xf32> to vector<8x8xf32>
    %239 = arith.addf %236, %238 : vector<8x8xf32>
    %c0_192 = arith.constant 0 : index
    %c0_193 = arith.constant 0 : index
    %240 = vector.load %arg7[%c0_192, %c0_193] : memref<8x8xf32, #tpu.memory_space<vmem>>, vector<8x8xf32>
    tpu.vector_store %arg7[%c0_192, %c0_193], %239 {strides = array<i32>} : memref<8x8xf32, #tpu.memory_space<vmem>>, vector<8x8xf32>,
    %c0_194 = arith.constant 0 : index
    %c0_195 = arith.constant 0 : index
    %c0_196 = arith.constant 0 : index
    %241 = vector.load %arg8[%c0_194, %c0_195, %c0_196] : memref<1x8x32xf32, #tpu.memory_space<vmem>>, vector<1x8x32xf32>
    %242 = vector.shape_cast %241 : vector<1x8x32xf32> to vector<8x32xf32>
    %243 = vector.shape_cast %232 : vector<8x32xf32> to vector<1x8x32xf32>
    tpu.vector_store %arg8[%c0_194, %c0_195, %c0_196], %243 {strides = array<i32>} : memref<1x8x32xf32, #tpu.memory_space<vmem>>, vector<1x8x32xf32>,
    return
  }
}

</mosaic_0001>

<bundles_post_ra>
// kernel: tpu_custom_call.1
= control target key start
LH: loop header
LB: loop body
LE: loop exit
PB: predicated region body
PF: predicated region fallthrough
CT: control target
= control target key end

     0   :  { %14 = vsyncpa [#allocation4], 0  ;;  %s5969_s0 = inlined_call_operand.vmem [shape: f32[200,16], index: 0, kind: input, shape index: {}]   ;;  %s5970_s1 = inlined_call_operand.vmem [shape: f32[1,8,32], index: 1, kind: input, shape index: {}]   ;;  %s5971_s2 = inlined_call_operand.hbm [shape: f32[16,32], index: 2, kind: input, shape index: {}]   ;;  %s5972_s3 = inlined_call_operand.vmem [shape: f32[32,32], index: 3, kind: input, shape index: {}]   ;;  %s5973_s4 = inlined_call_operand.vmem [shape: f32[1,32], index: 4, kind: input, shape index: {}]   ;;  %s5974_s5 = inlined_call_operand.vmem [shape: f32[25,8,32], index: 5, kind: input, shape index: {}]   ;;  %s5975_s6 = inlined_call_operand.vmem [shape: f32[1,8], index: 6, kind: input, shape index: {}]   ;;  %s5976_s7 = inlined_call_operand.hbm [shape: f32[8,8], index: 7, kind: output, shape index: {0}]   ;;  %s5977_s8 = inlined_call_operand.hbm [shape: f32[1,8,32], index: 8, kind: output, shape index: {1}]  }
   0x1   :  { %15 = vsyncpa [#allocation5], 0 }
   0x2   :  { %16 = vsyncpa [#allocation8], 0  ;;  %s5173_s27 = smov [#allocation3]  }
   0x3   :  { %s26_s28 = sshll.u32 %s5173_s27, 4  ;;  %s27_s28 = int_to_ptr.vmem [resolvable:$true] %s26_s28 }
   0x4   :  { %s5115_s29 = scalar_lea.vmem %s27_s28, 256  ;;  %p5120_p1 = scmp.lt.s32.totalorder %s27_s28, %s27_s28 }
   0x5   :  { %p5116_p0 = scmp.ne.s32.totalorder %s27_s28, %s5115_s29  ;;  %p5121_p2 = scmp.lt.s32.totalorder %s5115_s29, %s5115_s29 }
   0x7   :  { %p5122_p3 = por %p5121_p2, %p5120_p1 }
   0x9   :  { %p5123_p4 = pnand %p5122_p3, %p5116_p0 }
   0xb   :  { %5126 = shalt.err (!%p5123_p4)
}
   0xc   :  { %s5174_s30 = smov 128   ;;  %s5175_s9 = smov 8  }
   0xd   :  { %32 = dma.hbm_to_vmem [thread:$0]  %s5971_s2, 256, %s27_s28, [#allocation4], %s5174_s30, %s5174_s30, %s5175_s9  }
   0xe   :  { %5167 = dma.done.wait [#allocation4], 256  }
   0xf   :  { %5168 = vsyncadd [#allocation4], 4294967040  ;;  %v5176_v0 = vmov 0.0   ;;  %vm5177_vm0 = vmmov 0   ;;  %v70_v1 = vld [vmem:[#allocation3 + $0x8] sm:$0xff]  ;;  %v69_v2 = vld [vmem:[#allocation3] sm:$0xff] }
  0x10   :  { %4567 = vmatprep.subr.mxu0 %v5176_v0  ;;  %4571 = vmatprep.mubr.msk.f32.mxu0 %vm5177_vm0, %v5176_v0  ;;  %v44_v3 = vld [vmem:[%s5969_s0] sm:$0xff]  ;;  %vm78_vm1 = vcmask 130048   ;;  %v5240_v4 = vld [vmem:[%s5972_s3 + $0x18] sm:$0xff]  ;;  %v5245_v5 = vld [vmem:[%s5972_s3 + $0x10] sm:$0xff]  ;;  %vm344_vm2 = vcmask 261120   ;;  %s5178_s26 = smov [#allocation7]  }
  0x11   :  { %4646 = vmatprep.subr.mxu1 %v5176_v0  ;;  %4654 = vmatprep.mubr.msk.f32.mxu1 %vm5177_vm0, %v5176_v0  ;;  %v5253_v6 = vld [vmem:[%s5972_s3 + $0x8] sm:$0xff]  ;;  %v5261_v7 = vld [vmem:[%s5972_s3] sm:$0xff]  ;;  %v46_v23 = vld [vmem:[%s5969_s0 + $0x10] sm:$0xff]  ;;  %s4226_s27 = sshll.u32 %s5178_s26, 4  ;;  %s4227_s27 = int_to_ptr.vmem [resolvable:$true] %s4226_s27 }
  0x12   :  { %4568 = vmatpush3.msra.mxu0 %v70_v1  ;;  %4647 = vmatpush3.msra.mxu1 %v5240_v4  ;;  %v374_v8 = vld [vmem:[%s5970_s1] sm:$0xff]  ;;  %v45_v9 = vld [vmem:[%s5969_s0 + $0x8] sm:$0xff]  ;;  %v47_v33 = vld [vmem:[%s5969_s0 + $0x18] sm:$0xff]  ;;  %s5127_s28 = scalar_lea.vmem %s4227_s27, 128  ;;  %p5132_p6 = scmp.lt.s32.totalorder %s4227_s27, %s4227_s27 }
  0x13   :  { %4569 = vmatprep.subr.mxu0 %v5176_v0  ;;  %4648 = vmatprep.subr.mxu1 %v5176_v0  ;;  %v5301_v10 = vld [vmem:[%s5973_s4] ss:$0 sm:$0xff]  ;;  %v4267_v22 = vld [vmem:[%s5974_s5 + $0x8] sm:$0xff]  ;;  %v4273_v34 = vld [vmem:[%s5974_s5 + $0x10] sm:$0xff]  ;;  %p5128_p5 = scmp.ne.s32.totalorder %s4227_s27, %s5127_s28  ;;  %p5133_p7 = scmp.lt.s32.totalorder %s5127_s28, %s5127_s28 }
  0x14   :  { %4570 = vmatpush3.msra.mxu0 %v69_v2  ;;  %4649 = vmatpush3.msra.mxu1 %v5245_v5  ;;  %v451_v28 = vld [vmem:[%s5974_s5] sm:$0xff]  ;;  %v4277_v49 = vld [vmem:[%s5974_s5 + $0x18] sm:$0xff]  ;;  %v49_v61 = vld [vmem:[%s5969_s0 + $0x28] sm:$0xff] }
  0x15   :  { %4572 = vmatmul.mubr.msk.f32.vlgmr.msra.gmra.mxu0 %vm78_vm1, %v44_v3  ;;  %4650 = vmatprep.subr.mxu1 %v5176_v0  ;;  %v48_v48 = vld [vmem:[%s5969_s0 + $0x20] sm:$0xff]  ;;  %p5134_p8 = por %p5133_p7, %p5132_p6 }
  0x16   :  { %4574 = vmatprep.mubr.msk.f32.mxu0 %vm5177_vm0, %v5176_v0  ;;  %4651 = vmatpush3.msra.mxu1 %v5253_v6  ;;  %v4281_v62 = vld [vmem:[%s5974_s5 + $0x20] sm:$0xff] }
  0x17   :  { %4774 = vmatprep.subr.mxu0 %v5176_v0  ;;  %4652 = vmatprep.subr.mxu1 %v5176_v0  ;;  %p5135_p9 = pnand %p5134_p8, %p5128_p5 }
  0x18   :  { %4775 = vmatpush3.msra.mxu0 %v5240_v4  ;;  %4653 = vmatpush3.msra.mxu1 %v5261_v7 }
  0x19   :  { %4776 = vmatprep.subr.mxu0 %v5176_v0  ;;  %4655 = vmatmul.mubr.msk.f32.vlgmr.msra.gmra.mxu1 %vm344_vm2, %v374_v8 }
  0x1a   :  { %4657 = vmatprep.subr.mxu1 %v5176_v0  ;;  %4665 = vmatprep.mubr.msk.f32.mxu1 %vm5177_vm0, %v5176_v0 }
  0x1b   :  { %4658 = vmatpush3.msra.mxu1 %v5240_v4  ;;  %4777 = vmatpush3.msra.mxu0 %v5245_v5 }
  0x1c   :  { %4659 = vmatprep.subr.mxu1 %v5176_v0  ;;  %4778 = vmatprep.subr.mxu0 %v5176_v0 }
  0x1d   :  { %4660 = vmatpush3.msra.mxu1 %v5245_v5  ;;  %4779 = vmatpush3.msra.mxu0 %v5253_v6 }
  0x1e   :  { %4661 = vmatprep.subr.mxu1 %v5176_v0  ;;  %4780 = vmatprep.subr.mxu0 %v5176_v0 }
  0x1f   :  { %4662 = vmatpush3.msra.mxu1 %v5253_v6  ;;  %4781 = vmatpush3.msra.mxu0 %v5261_v7 }
  0x20   :  { %4663 = vmatprep.subr.mxu1 %v5176_v0  ;;  %4801 = vmatprep.subr.mxu0 %v5176_v0 }
  0x21   :  { %4664 = vmatpush3.msra.mxu1 %v5261_v7  ;;  %4575 = vmatmul.mubr.msk.f32.gmra.mxu0 %vm78_vm1, %v45_v9 }
  0x22   :  { %4668 = vmatprep.subr.mxu1 %v5176_v0  ;;  %4577 = vmatprep.mubr.msk.f32.mxu0 %vm5177_vm0, %v5176_v0 }
  0x25   :  { %4578 = vmatmul.mubr.msk.f32.gmra.mxu0 %vm78_vm1, %v46_v23 }
  0x26   :  { %4580 = vmatprep.mubr.msk.f32.mxu0 %vm5177_vm0, %v5176_v0 }
  0x29   :  { %4581 = vmatmul.mubr.msk.f32.gmra.mxu0 %vm78_vm1, %v47_v33  ;;  %v54_v33 = vld [vmem:[%s5969_s0 + $0x50] sm:$0xff] }
  0x2a   :  { %4583 = vmatprep.mubr.msk.f32.mxu0 %vm5177_vm0, %v5176_v0 }
  0x2d   :  { %4584 = vmatmul.mubr.msk.f32.gmra.mxu0 %vm78_vm1, %v48_v48 }
  0x2e   :  { %4586 = vmatprep.mubr.msk.f32.mxu0 %vm5177_vm0, %v5176_v0 }
  0x31   :  { %4587 = vmatmul.mubr.msk.f32.gmra.mxu0 %vm78_vm1, %v49_v61 }
  0x32   :  { %4589 = vmatprep.mubr.msk.f32.mxu0 %vm5177_vm0, %v5176_v0 }
  0xd5   :  { %v220_v11 = vpop.f32.mrf.mxu0 }
  0xd6   :  { %v221_v12 = vadd.f32 %v5301_v10, %v220_v11 }
  0xd7   :  { %v4573_v13 = vpop.f32.mrf.mxu0 }
  0xd8   :  { %345 = vst.msk [vmem:[#allocation2] sm:$0xff] %vm344_vm2, %v221_v12 }
  0xd9   :  { %v445_v14 = vpop.f32.mrf.mxu1 }
  0xdb   :  { %v4656_v15 = vpop.f32.mrf.mxu1 }
  0xdf   :  { %v375_v16 = vld [vmem:[#allocation2] sm:$0xff] }
  0xe0   :  { %v449_v17 = vadd.f32 %v445_v14, %v375_v16  ;;  %v50_v16 = vld [vmem:[%s5969_s0 + $0x30] sm:$0xff] }
  0xe1   :  { %v225_v19 = vpop.f32.mrf.mxu0  ;;  %4590 = vmatmul.mubr.msk.f32.gmra.mxu0 %vm78_vm1, %v50_v16 }
  0xe2   :  { %5053 = vtanh.f32 %v449_v17  ;;  %v226_v20 = vadd.f32 %v5301_v10, %v225_v19  ;;  %v4285_v17 = vld [vmem:[%s5974_s5 + $0x28] sm:$0xff]  ;;  %4592 = vmatprep.mubr.msk.f32.mxu0 %vm5177_vm0, %v5176_v0 }
  0xe3   :  { %v4576_v21 = vpop.f32.mrf.mxu0 }
  0xe4   :  { %346 = vst.msk [vmem:[#allocation2 + $0x8] sm:$0xff] %vm344_vm2, %v226_v20 }
  0xe5   :  { %v230_v30 = vpop.f32.mrf.mxu0 }
  0xe6   :  { %v231_v31 = vadd.f32 %v5301_v10, %v230_v30  ;;  %v4289_v30 = vld [vmem:[%s5974_s5 + $0x30] sm:$0xff] }
  0xe7   :  { %v4579_v32 = vpop.f32.mrf.mxu0 }
  0xe8   :  { %347 = vst.msk [vmem:[#allocation2 + $0x10] sm:$0xff] %vm344_vm2, %v231_v31  ;;  %v52_v31 = vld [vmem:[%s5969_s0 + $0x40] sm:$0xff]  ;;  %v53_v32 = vld [vmem:[%s5969_s0 + $0x48] sm:$0xff] }
  0xe9   :  { %v235_v45 = vpop.f32.mrf.mxu0 }
  0xea   :  { %v236_v46 = vadd.f32 %v5301_v10, %v235_v45 }
  0xeb   :  { %v453_v24 = vld [vmem:[#allocation2 + $0x8] sm:$0xff]  ;;  %v4582_v47 = vpop.f32.mrf.mxu0 }
  0xec   :  { %348 = vst.msk [vmem:[#allocation2 + $0x18] sm:$0xff] %vm344_vm2, %v236_v46 }
  0xed   :  { %v240_v58 = vpop.f32.mrf.mxu0 }
  0xee   :  { %v241_v59 = vadd.f32 %v5301_v10, %v240_v58  ;;  %v67_v58 = vld [vmem:[%s5969_s0 + $0xb8] sm:$0xff] }
  0xef   :  { %v5054_v18 = vpop.eup %5053  ;;  %v681_v40 = vld [vmem:[#allocation2 + $0x10] sm:$0xff]  ;;  %v4585_v60 = vpop.f32.mrf.mxu0 }
  0xf0   :  { %4666 = vmatmul.mubr.msk.f32.vlgmr.msra.gmra.mxu1 %vm344_vm2, %v5054_v18  ;;  %349 = vst.msk [vmem:[#allocation2 + $0x20] sm:$0xff] %vm344_vm2, %v241_v59  ;;  %v68_v59 = vld [vmem:[%s5969_s0 + $0xc0] sm:$0xff] }
  0xf1   :  { %4670 = vmatprep.mubr.msk.f32.mxu1 %vm5177_vm0, %v5176_v0  ;;  %4669 = vmatpush3.xpose.msk.msra.mxu1 %vm344_vm2, %v4267_v22  ;;  %v245_v13 = vpop.f32.mrf.mxu0 }
  0xf2   :  { %4673 = vmatprep.subr.mxu1 %v5176_v0  ;;  %v246_v14 = vadd.f32 %v5301_v10, %v245_v13 }
  0xf3   :  { %v834_v53 = vld [vmem:[#allocation2 + $0x18] sm:$0xff]  ;;  %v4588_v15 = vpop.f32.mrf.mxu0 }
  0xf4   :  { %350 = vst.msk [vmem:[#allocation2 + $0x28] sm:$0xff] %vm344_vm2, %v246_v14 }
  0xf7   :  { %v987_v3 = vld [vmem:[#allocation2 + $0x20] sm:$0xff] }
  0xfb   :  { %v1140_v21 = vld [vmem:[#allocation2 + $0x28] sm:$0xff] }
 0x1b0   :  { %v523_v25 = vpop.f32.mrf.mxu1 }
 0x1b1   :  { %v527_v26 = vadd.f32 %v523_v25, %v453_v24 }
 0x1b2   :  { %v4667_v27 = vpop.f32.mrf.mxu1 }
 0x1b3   :  { %5055 = vtanh.f32 %v527_v26  ;;  %v250_v26 = vpop.f32.mrf.mxu0 }
 0x1b4   :  { %v251_v27 = vadd.f32 %v5301_v10, %v250_v26 }
 0x1b6   :  { %351 = vst.msk [vmem:[#allocation2 + $0x30] sm:$0xff] %vm344_vm2, %v251_v27 }
 0x1bd   :  { %v1293_v46 = vld [vmem:[#allocation2 + $0x30] sm:$0xff] }
 0x1c0   :  { %v5056_v29 = vpop.eup %5055 }
 0x1c1   :  { %4671 = vmatmul.mubr.msk.f32.vlgmr.msra.gmra.mxu1 %vm344_vm2, %v5056_v29 }
 0x1c2   :  { %4674 = vmatpush3.xpose.msk.msra.mxu1 %vm344_vm2, %v451_v28  ;;  %4675 = vmatprep.mubr.msk.f32.mxu1 %vm5177_vm0, %v5176_v0  ;;  %v4591_v28 = vpop.f32.mrf.mxu0 }
 0x1c3   :  { %4678 = vmatprep.subr.mxu1 %v5176_v0 }
 0x1c5   :  { %4676 = vmatmul.mubr.msk.f32.vlgmr.msra.gmra.mxu1 %vm344_vm2, %v5054_v18 }
 0x1c6   :  { %4679 = vmatpush3.msra.mxu1 %v5240_v4  ;;  %4686 = vmatprep.mubr.msk.f32.mxu1 %vm5177_vm0, %v5176_v0 }
 0x1c7   :  { %4680 = vmatprep.subr.mxu1 %v5176_v0 }
 0x1c8   :  { %4681 = vmatpush3.msra.mxu1 %v5245_v5 }
 0x1c9   :  { %4682 = vmatprep.subr.mxu1 %v5176_v0 }
 0x1ca   :  { %4683 = vmatpush3.msra.mxu1 %v5253_v6 }
 0x1cb   :  { %4684 = vmatprep.subr.mxu1 %v5176_v0 }
 0x1cc   :  { %4685 = vmatpush3.msra.mxu1 %v5261_v7 }
 0x1cd   :  { %4687 = vmatmul.mubr.msk.f32.vlgmr.msra.gmra.mxu1 %vm344_vm2, %v5056_v29  ;;  %4689 = vmatprep.subr.mxu1 %v5176_v0  ;;  %v51_v29 = vld [vmem:[%s5969_s0 + $0x38] sm:$0xff] }
 0x1ce   :  { %4691 = vmatprep.mubr.msk.f32.mxu1 %vm5177_vm0, %v5176_v0  ;;  %4690 = vmatpush3.xpose.msk.msra.mxu1 %vm344_vm2, %v4273_v34  ;;  %v55_v34 = vld [vmem:[%s5969_s0 + $0x58] sm:$0xff] }
 0x1cf   :  { %4694 = vmatprep.subr.mxu1 %v5176_v0  ;;  %4593 = vmatmul.mubr.msk.f32.gmra.mxu0 %vm78_vm1, %v51_v29 }
 0x1d0   :  { %4595 = vmatprep.mubr.msk.f32.mxu0 %vm5177_vm0, %v5176_v0 }
 0x1d3   :  { %4596 = vmatmul.mubr.msk.f32.gmra.mxu0 %vm78_vm1, %v52_v31 }
 0x1d4   :  { %4598 = vmatprep.mubr.msk.f32.mxu0 %vm5177_vm0, %v5176_v0 }
 0x1d7   :  { %4599 = vmatmul.mubr.msk.f32.gmra.mxu0 %vm78_vm1, %v53_v32 }
 0x1d8   :  { %4601 = vmatprep.mubr.msk.f32.mxu0 %vm5177_vm0, %v5176_v0 }
 0x1db   :  { %4602 = vmatmul.mubr.msk.f32.gmra.mxu0 %vm78_vm1, %v54_v33 }
 0x1dc   :  { %4604 = vmatprep.mubr.msk.f32.mxu0 %vm5177_vm0, %v5176_v0 }
 0x1df   :  { %4605 = vmatmul.mubr.msk.f32.gmra.mxu0 %vm78_vm1, %v55_v34 }
 0x1e0   :  { %4607 = vmatprep.mubr.msk.f32.mxu0 %vm5177_vm0, %v5176_v0 }
 0x281   :  { %v603_v35 = vpop.f32.mrf.mxu1 }
 0x283   :  { %v4672_v36 = vpop.f32.mrf.mxu1 }
 0x284   :  { %v57_v36 = vld [vmem:[%s5969_s0 + $0x68] sm:$0xff] }
 0x285   :  { %v676_v37 = vpop.f32.mrf.mxu1 }
 0x286   :  { %v677_v38 = vadd.f32 %v676_v37, %v603_v35  ;;  %v56_v35 = vld [vmem:[%s5969_s0 + $0x60] sm:$0xff]  ;;  %v58_v37 = vld [vmem:[%s5969_s0 + $0x70] sm:$0xff] }
 0x287   :  { %v4677_v39 = vpop.f32.mrf.mxu1  ;;  %4608 = vmatmul.mubr.msk.f32.gmra.mxu0 %vm78_vm1, %v56_v35 }
 0x288   :  { %4610 = vmatprep.mubr.msk.f32.mxu0 %vm5177_vm0, %v5176_v0  ;;  %v60_v39 = vld [vmem:[%s5969_s0 + $0x80] sm:$0xff] }
 0x28b   :  { %4611 = vmatmul.mubr.msk.f32.gmra.mxu0 %vm78_vm1, %v57_v36 }
 0x28c   :  { %4613 = vmatprep.mubr.msk.f32.mxu0 %vm5177_vm0, %v5176_v0 }
 0x28d   :  { %v748_v41 = vpop.f32.mrf.mxu1 }
 0x28e   :  { %v752_v42 = vadd.f32 %v748_v41, %v681_v40  ;;  %v61_v40 = vld [vmem:[%s5969_s0 + $0x88] sm:$0xff]  ;;  %v62_v41 = vld [vmem:[%s5969_s0 + $0x90] sm:$0xff] }
 0x28f   :  { %v4688_v43 = vpop.f32.mrf.mxu1  ;;  %4614 = vmatmul.mubr.msk.f32.gmra.mxu0 %vm78_vm1, %v58_v37 }
 0x290   :  { %5057 = vtanh.f32 %v752_v42  ;;  %4616 = vmatprep.mubr.msk.f32.mxu0 %vm5177_vm0, %v5176_v0  ;;  %v63_v42 = vld [vmem:[%s5969_s0 + $0x98] sm:$0xff] }
 0x29d   :  { %v5058_v44 = vpop.eup %5057 }
 0x29e   :  { %4692 = vmatmul.mubr.msk.f32.vlgmr.msra.gmra.mxu1 %vm344_vm2, %v5058_v44 }
 0x29f   :  { %4695 = vmatpush3.msra.mxu1 %v5240_v4  ;;  %4702 = vmatprep.mubr.msk.f32.mxu1 %vm5177_vm0, %v5176_v0 }
 0x2a0   :  { %4696 = vmatprep.subr.mxu1 %v5176_v0 }
 0x2a1   :  { %4697 = vmatpush3.msra.mxu1 %v5245_v5 }
 0x2a2   :  { %4698 = vmatprep.subr.mxu1 %v5176_v0 }
 0x2a3   :  { %4699 = vmatpush3.msra.mxu1 %v5253_v6 }
 0x2a4   :  { %4700 = vmatprep.subr.mxu1 %v5176_v0 }
 0x2a5   :  { %4701 = vmatpush3.msra.mxu1 %v5261_v7 }
 0x2a6   :  { %4703 = vmatmul.mubr.msk.f32.vlgmr.msra.gmra.mxu1 %vm344_vm2, %v5058_v44  ;;  %4705 = vmatprep.subr.mxu1 %v5176_v0 }
 0x2a7   :  { %4707 = vmatprep.mubr.msk.f32.mxu1 %vm5177_vm0, %v5176_v0  ;;  %4706 = vmatpush3.xpose.msk.msra.mxu1 %vm344_vm2, %v4277_v49 }
 0x2a8   :  { %4710 = vmatprep.subr.mxu1 %v5176_v0 }
 0x35e   :  { %v828_v50 = vpop.f32.mrf.mxu1 }
 0x35f   :  { %v832_v51 = vadd.f32 %v828_v50, %v677_v38  ;;  %v59_v38 = vld [vmem:[%s5969_s0 + $0x78] sm:$0xff] }
 0x360   :  { %v4693_v52 = vpop.f32.mrf.mxu1  ;;  %4617 = vmatmul.mubr.msk.f32.gmra.mxu0 %vm78_vm1, %v59_v38 }
 0x361   :  { %4619 = vmatprep.mubr.msk.f32.mxu0 %vm5177_vm0, %v5176_v0 }
 0x364   :  { %4620 = vmatmul.mubr.msk.f32.gmra.mxu0 %vm78_vm1, %v60_v39 }
 0x365   :  { %4622 = vmatprep.mubr.msk.f32.mxu0 %vm5177_vm0, %v5176_v0 }
 0x366   :  { %v901_v54 = vpop.f32.mrf.mxu1 }
 0x367   :  { %v905_v55 = vadd.f32 %v901_v54, %v834_v53  ;;  %v64_v54 = vld [vmem:[%s5969_s0 + $0xa0] sm:$0xff] }
 0x368   :  { %v4704_v56 = vpop.f32.mrf.mxu1  ;;  %4623 = vmatmul.mubr.msk.f32.gmra.mxu0 %vm78_vm1, %v61_v40 }
 0x369   :  { %5059 = vtanh.f32 %v905_v55  ;;  %4625 = vmatprep.mubr.msk.f32.mxu0 %vm5177_vm0, %v5176_v0  ;;  %v65_v55 = vld [vmem:[%s5969_s0 + $0xa8] sm:$0xff]  ;;  %v66_v56 = vld [vmem:[%s5969_s0 + $0xb0] sm:$0xff] }
 0x36c   :  { %4626 = vmatmul.mubr.msk.f32.gmra.mxu0 %vm78_vm1, %v62_v41 }
 0x36d   :  { %4628 = vmatprep.mubr.msk.f32.mxu0 %vm5177_vm0, %v5176_v0 }
 0x370   :  { %4629 = vmatmul.mubr.msk.f32.gmra.mxu0 %vm78_vm1, %v63_v42 }
 0x371   :  { %4631 = vmatprep.mubr.msk.f32.mxu0 %vm5177_vm0, %v5176_v0 }
 0x374   :  { %4632 = vmatmul.mubr.msk.f32.gmra.mxu0 %vm78_vm1, %v64_v54 }
 0x375   :  { %4634 = vmatprep.mubr.msk.f32.mxu0 %vm5177_vm0, %v5176_v0 }
 0x376   :  { %v5060_v57 = vpop.eup %5059 }
 0x377   :  { %4708 = vmatmul.mubr.msk.f32.vlgmr.msra.gmra.mxu1 %vm344_vm2, %v5060_v57 }
 0x378   :  { %4711 = vmatpush3.msra.mxu1 %v5240_v4  ;;  %4718 = vmatprep.mubr.msk.f32.mxu1 %vm5177_vm0, %v5176_v0 }
 0x379   :  { %4712 = vmatprep.subr.mxu1 %v5176_v0  ;;  %4635 = vmatmul.mubr.msk.f32.gmra.mxu0 %vm78_vm1, %v65_v55 }
 0x37a   :  { %4713 = vmatpush3.msra.mxu1 %v5245_v5  ;;  %4637 = vmatprep.mubr.msk.f32.mxu0 %vm5177_vm0, %v5176_v0 }
 0x37b   :  { %4714 = vmatprep.subr.mxu1 %v5176_v0 }
 0x37c   :  { %4715 = vmatpush3.msra.mxu1 %v5253_v6 }
 0x37d   :  { %4716 = vmatprep.subr.mxu1 %v5176_v0  ;;  %4638 = vmatmul.mubr.msk.f32.gmra.mxu0 %vm78_vm1, %v66_v56 }
 0x37e   :  { %4717 = vmatpush3.msra.mxu1 %v5261_v7  ;;  %4640 = vmatprep.mubr.msk.f32.mxu0 %vm5177_vm0, %v5176_v0 }
 0x37f   :  { %4719 = vmatmul.mubr.msk.f32.vlgmr.msra.gmra.mxu1 %vm344_vm2, %v5060_v57  ;;  %4721 = vmatprep.subr.mxu1 %v5176_v0  ;;  %v4293_v57 = vld [vmem:[%s5974_s5 + $0x38] sm:$0xff] }
 0x380   :  { %4723 = vmatprep.mubr.msk.f32.mxu1 %vm5177_vm0, %v5176_v0  ;;  %4722 = vmatpush3.xpose.msk.msra.mxu1 %vm344_vm2, %v4281_v62 }
 0x381   :  { %4726 = vmatprep.subr.mxu1 %v5176_v0  ;;  %4641 = vmatmul.mubr.msk.f32.gmra.mxu0 %vm78_vm1, %v67_v58 }
 0x382   :  { %4643 = vmatprep.mubr.msk.f32.mxu0 %vm5177_vm0, %v5176_v0 }
 0x385   :  { %4644 = vmatmul.mubr.msk.f32.gmra.mxu0 %vm78_vm1, %v68_v59 }
 0x386   :  { %4782 = vmatprep.mubr.msk.f32.mxu0 %vm5177_vm0, %v5176_v0 }
 0x437   :  { %v981_v63 = vpop.f32.mrf.mxu1 }
 0x438   :  { %v985_v1 = vadd.f32 %v981_v63, %v832_v51  ;;  %v255_v51 = vpop.f32.mrf.mxu0 }
 0x439   :  { %v4709_v2 = vpop.f32.mrf.mxu1  ;;  %v256_v52 = vadd.f32 %v5301_v10, %v255_v51 }
 0x43a   :  { %v4594_v53 = vpop.f32.mrf.mxu0 }
 0x43b   :  { %352 = vst.msk [vmem:[#allocation2 + $0x38] sm:$0xff] %vm344_vm2, %v256_v52 }
 0x43c   :  { %v260_v60 = vpop.f32.mrf.mxu0 }
 0x43d   :  { %v261_v61 = vadd.f32 %v5301_v10, %v260_v60 }
 0x43e   :  { %v4597_v62 = vpop.f32.mrf.mxu0 }
 0x43f   :  { %v1054_v8 = vpop.f32.mrf.mxu1  ;;  %353 = vst.msk [vmem:[#allocation2 + $0x40] sm:$0xff] %vm344_vm2, %v261_v61  ;;  %v4297_v61 = vld [vmem:[%s5974_s5 + $0x40] sm:$0xff] }
 0x440   :  { %v1058_v9 = vadd.f32 %v1054_v8, %v987_v3  ;;  %v265_v63 = vpop.f32.mrf.mxu0 }
 0x441   :  { %v4720_v11 = vpop.f32.mrf.mxu1 }
 0x442   :  { %5061 = vtanh.f32 %v1058_v9  ;;  %v4600_v2 = vpop.f32.mrf.mxu0  ;;  %v1446_v41 = vld [vmem:[#allocation2 + $0x38] sm:$0xff] }
 0x444   :  { %v270_v3 = vpop.f32.mrf.mxu0 }
 0x445   :  { %v271_v8 = vadd.f32 %v5301_v10, %v270_v3 }
 0x446   :  { %v4603_v9 = vpop.f32.mrf.mxu0 }
 0x447   :  { %355 = vst.msk [vmem:[#allocation2 + $0x50] sm:$0xff] %vm344_vm2, %v271_v8 }
 0x448   :  { %v275_v11 = vpop.f32.mrf.mxu0 }
 0x44a   :  { %v4606_v13 = vpop.f32.mrf.mxu0 }
 0x44c   :  { %v280_v14 = vpop.f32.mrf.mxu0 }
 0x44d   :  { %v281_v15 = vadd.f32 %v5301_v10, %v280_v14 }
 0x44e   :  { %v4609_v16 = vpop.f32.mrf.mxu0 }
 0x44f   :  { %v5062_v12 = vpop.eup %5061  ;;  %357 = vst.msk [vmem:[#allocation2 + $0x60] sm:$0xff] %vm344_vm2, %v281_v15 }
 0x450   :  { %4724 = vmatmul.mubr.msk.f32.vlgmr.msra.gmra.mxu1 %vm344_vm2, %v5062_v12 }
 0x451   :  { %4727 = vmatpush3.msra.mxu1 %v5240_v4  ;;  %4734 = vmatprep.mubr.msk.f32.mxu1 %vm5177_vm0, %v5176_v0 }
 0x452   :  { %4728 = vmatprep.subr.mxu1 %v5176_v0 }
 0x453   :  { %4729 = vmatpush3.msra.mxu1 %v5245_v5 }
 0x454   :  { %4730 = vmatprep.subr.mxu1 %v5176_v0 }
 0x455   :  { %4731 = vmatpush3.msra.mxu1 %v5253_v6 }
 0x456   :  { %4732 = vmatprep.subr.mxu1 %v5176_v0 }
 0x457   :  { %4733 = vmatpush3.msra.mxu1 %v5261_v7 }
 0x458   :  { %4735 = vmatmul.mubr.msk.f32.vlgmr.msra.gmra.mxu1 %vm344_vm2, %v5062_v12  ;;  %4737 = vmatprep.subr.mxu1 %v5176_v0  ;;  %v276_v12 = vadd.f32 %v5301_v10, %v275_v11  ;;  %v4301_v11 = vld [vmem:[%s5974_s5 + $0x48] sm:$0xff] }
 0x459   :  { %4739 = vmatprep.mubr.msk.f32.mxu1 %vm5177_vm0, %v5176_v0  ;;  %4738 = vmatpush3.xpose.msk.msra.mxu1 %vm344_vm2, %v4285_v17  ;;  %v285_v17 = vpop.f32.mrf.mxu0 }
 0x45a   :  { %4742 = vmatprep.subr.mxu1 %v5176_v0  ;;  %356 = vst.msk [vmem:[#allocation2 + $0x58] sm:$0xff] %vm344_vm2, %v276_v12 }
 0x510   :  { %v1134_v18 = vpop.f32.mrf.mxu1 }
 0x511   :  { %v5437_v19 = vadd.f32 %v1134_v18, %v985_v1  ;;  %v266_v1 = vadd.f32 %v5301_v10, %v265_v63  ;;  %v286_v18 = vadd.f32 %v5301_v10, %v285_v17  ;;  %v1599_v63 = vld [vmem:[#allocation2 + $0x40] sm:$0xff] }
 0x512   :  { %v4725_v20 = vpop.f32.mrf.mxu1 }
 0x513   :  { %354 = vst.msk [vmem:[#allocation2 + $0x48] sm:$0xff] %vm344_vm2, %v266_v1  ;;  %358 = vst.msk [vmem:[#allocation2 + $0x68] sm:$0xff] %vm344_vm2, %v286_v18 }
 0x518   :  { %v1207_v22 = vpop.f32.mrf.mxu1 }
 0x519   :  { %v1211_v23 = vadd.f32 %v1207_v22, %v1140_v21 }
 0x51a   :  { %v4736_v24 = vpop.f32.mrf.mxu1  ;;  %v1752_v15 = vld [vmem:[#allocation2 + $0x48] sm:$0xff] }
 0x51b   :  { %5063 = vtanh.f32 %v1211_v23 }
 0x528   :  { %v5064_v25 = vpop.eup %5063 }
 0x529   :  { %4740 = vmatmul.mubr.msk.f32.vlgmr.msra.gmra.mxu1 %vm344_vm2, %v5064_v25 }
 0x52a   :  { %4743 = vmatpush3.msra.mxu1 %v5240_v4  ;;  %4750 = vmatprep.mubr.msk.f32.mxu1 %vm5177_vm0, %v5176_v0 }
 0x52b   :  { %4744 = vmatprep.subr.mxu1 %v5176_v0 }
 0x52c   :  { %4745 = vmatpush3.msra.mxu1 %v5245_v5 }
 0x52d   :  { %4746 = vmatprep.subr.mxu1 %v5176_v0 }
 0x52e   :  { %4747 = vmatpush3.msra.mxu1 %v5253_v6 }
 0x52f   :  { %4748 = vmatprep.subr.mxu1 %v5176_v0 }
 0x530   :  { %4749 = vmatpush3.msra.mxu1 %v5261_v7 }
 0x531   :  { %4751 = vmatmul.mubr.msk.f32.vlgmr.msra.gmra.mxu1 %vm344_vm2, %v5064_v25  ;;  %4753 = vmatprep.subr.mxu1 %v5176_v0 }
 0x532   :  { %4755 = vmatprep.mubr.msk.f32.mxu1 %vm5177_vm0, %v5176_v0  ;;  %4754 = vmatpush3.xpose.msk.msra.mxu1 %vm344_vm2, %v4289_v30 }
 0x533   :  { %4758 = vmatprep.subr.mxu1 %v5176_v0 }
 0x5e9   :  { %v1287_v43 = vpop.f32.mrf.mxu1 }
 0x5ea   :  { %v5539_v44 = vadd.f32 %v1287_v43, %v5437_v19  ;;  %v4612_v19 = vpop.f32.mrf.mxu0 }
 0x5eb   :  { %v4741_v45 = vpop.f32.mrf.mxu1 }
 0x5ec   :  { %v290_v20 = vpop.f32.mrf.mxu0 }
 0x5ed   :  { %v291_v21 = vadd.f32 %v5301_v10, %v290_v20  ;;  %v4305_v20 = vld [vmem:[%s5974_s5 + $0x50] sm:$0xff] }
 0x5ee   :  { %v4615_v22 = vpop.f32.mrf.mxu0 }
 0x5ef   :  { %359 = vst.msk [vmem:[#allocation2 + $0x70] sm:$0xff] %vm344_vm2, %v291_v21 }
 0x5f0   :  { %v295_v23 = vpop.f32.mrf.mxu0 }
 0x5f1   :  { %v1360_v47 = vpop.f32.mrf.mxu1  ;;  %v296_v24 = vadd.f32 %v5301_v10, %v295_v23 }
 0x5f2   :  { %v1364_v48 = vadd.f32 %v1360_v47, %v1293_v46  ;;  %v4618_v25 = vpop.f32.mrf.mxu0 }
 0x5f3   :  { %v4752_v49 = vpop.f32.mrf.mxu1  ;;  %360 = vst.msk [vmem:[#allocation2 + $0x78] sm:$0xff] %vm344_vm2, %v296_v24  ;;  %v1905_v24 = vld [vmem:[#allocation2 + $0x50] sm:$0xff] }
 0x5f4   :  { %5065 = vtanh.f32 %v1364_v48  ;;  %v300_v26 = vpop.f32.mrf.mxu0 }
 0x5f5   :  { %v301_v27 = vadd.f32 %v5301_v10, %v300_v26 }
 0x5f6   :  { %v4621_v28 = vpop.f32.mrf.mxu0 }
 0x5f7   :  { %361 = vst.msk [vmem:[#allocation2 + $0x80] sm:$0xff] %vm344_vm2, %v301_v27 }
 0x5f8   :  { %v305_v29 = vpop.f32.mrf.mxu0 }
 0x5f9   :  { %v306_v30 = vadd.f32 %v5301_v10, %v305_v29  ;;  %v4309_v29 = vld [vmem:[%s5974_s5 + $0x58] sm:$0xff] }
 0x5fa   :  { %v4624_v31 = vpop.f32.mrf.mxu0 }
 0x5fb   :  { %362 = vst.msk [vmem:[#allocation2 + $0x88] sm:$0xff] %vm344_vm2, %v306_v30 }
 0x5fc   :  { %v310_v32 = vpop.f32.mrf.mxu0 }
 0x5fd   :  { %v311_v33 = vadd.f32 %v5301_v10, %v310_v32 }
 0x5fe   :  { %v4627_v34 = vpop.f32.mrf.mxu0 }
 0x5ff   :  { %363 = vst.msk [vmem:[#allocation2 + $0x90] sm:$0xff] %vm344_vm2, %v311_v33  ;;  %v2058_v33 = vld [vmem:[#allocation2 + $0x58] sm:$0xff] }
 0x600   :  { %v315_v35 = vpop.f32.mrf.mxu0 }
 0x601   :  { %v5066_v50 = vpop.eup %5065  ;;  %v316_v36 = vadd.f32 %v5301_v10, %v315_v35 }
 0x602   :  { %4756 = vmatmul.mubr.msk.f32.vlgmr.msra.gmra.mxu1 %vm344_vm2, %v5066_v50  ;;  %v4630_v37 = vpop.f32.mrf.mxu0 }
 0x603   :  { %4759 = vmatpush3.msra.mxu1 %v5240_v4  ;;  %4766 = vmatprep.mubr.msk.f32.mxu1 %vm5177_vm0, %v5176_v0  ;;  %364 = vst.msk [vmem:[#allocation2 + $0x98] sm:$0xff] %vm344_vm2, %v316_v36 }
 0x604   :  { %4760 = vmatprep.subr.mxu1 %v5176_v0  ;;  %v320_v47 = vpop.f32.mrf.mxu0 }
 0x605   :  { %4761 = vmatpush3.msra.mxu1 %v5245_v5 }
 0x606   :  { %4762 = vmatprep.subr.mxu1 %v5176_v0  ;;  %v4633_v48 = vpop.f32.mrf.mxu0 }
 0x607   :  { %4763 = vmatpush3.msra.mxu1 %v5253_v6  ;;  %v2364_v48 = vld [vmem:[#allocation2 + $0x68] sm:$0xff] }
 0x608   :  { %4764 = vmatprep.subr.mxu1 %v5176_v0  ;;  %v325_v49 = vpop.f32.mrf.mxu0 }
 0x609   :  { %4765 = vmatpush3.msra.mxu1 %v5261_v7 }
 0x60a   :  { %4767 = vmatmul.mubr.msk.f32.vlgmr.msra.gmra.mxu1 %vm344_vm2, %v5066_v50  ;;  %4769 = vmatprep.subr.mxu1 %v5176_v0  ;;  %v326_v50 = vadd.f32 %v5301_v10, %v325_v49  ;;  %v4636_v51 = vpop.f32.mrf.mxu0 }
 0x60b   :  { %4771 = vmatprep.mubr.msk.f32.mxu1 %vm5177_vm0, %v5176_v0  ;;  %4770 = vmatpush3.xpose.msk.msra.mxu1 %vm344_vm2, %v4293_v57 }
 0x60c   :  { %4785 = vmatprep.subr.mxu1 %v5176_v0  ;;  %366 = vst.msk [vmem:[#allocation2 + $0xa8] sm:$0xff] %vm344_vm2, %v326_v50  ;;  %v330_v52 = vpop.f32.mrf.mxu0 }
 0x60d   :  { %v331_v53 = vadd.f32 %v5301_v10, %v330_v52  ;;  %v5737_v52 = vld [vmem:[%s5972_s3 + $0x18] sm:$0xff] }
 0x60e   :  { %v4639_v54 = vpop.f32.mrf.mxu0 }
 0x60f   :  { %367 = vst.msk [vmem:[#allocation2 + $0xb0] sm:$0xff] %vm344_vm2, %v331_v53  ;;  %v5746_v53 = vld [vmem:[%s5972_s3 + $0x10] sm:$0xff]  ;;  %v5753_v54 = vld [vmem:[%s5972_s3 + $0x8] sm:$0xff] }
 0x610   :  { %v335_v55 = vpop.f32.mrf.mxu0 }
 0x611   :  { %v336_v56 = vadd.f32 %v5301_v10, %v335_v55  ;;  %v5760_v55 = vld [vmem:[%s5972_s3] sm:$0xff] }
 0x612   :  { %v4642_v57 = vpop.f32.mrf.mxu0 }
 0x613   :  { %368 = vst.msk [vmem:[#allocation2 + $0xb8] sm:$0xff] %vm344_vm2, %v336_v56  ;;  %v4321_v56 = vld [vmem:[%s5974_s5 + $0x70] sm:$0xff] }
 0x614   :  { %v340_v58 = vpop.f32.mrf.mxu0 }
 0x615   :  { %v341_v59 = vadd.f32 %v5301_v10, %v340_v58 }
 0x616   :  { %v4645_v60 = vpop.f32.mrf.mxu0 }
 0x617   :  { %369 = vst.msk [vmem:[#allocation2 + $0xc0] sm:$0xff] %vm344_vm2, %v341_v59  ;;  %v2517_v60 = vld [vmem:[#allocation2 + $0x70] sm:$0xff] }
 0x6c2   :  { %v1440_v38 = vpop.f32.mrf.mxu1 }
 0x6c3   :  { %v1444_v39 = vadd.f32 %v1440_v38, %v5539_v44  ;;  %v321_v44 = vadd.f32 %v5301_v10, %v320_v47  ;;  %v4313_v38 = vld [vmem:[%s5974_s5 + $0x60] sm:$0xff] }
 0x6c4   :  { %v4757_v40 = vpop.f32.mrf.mxu1 }
 0x6c5   :  { %365 = vst.msk [vmem:[#allocation2 + $0xa0] sm:$0xff] %vm344_vm2, %v321_v44 }
 0x6ca   :  { %v1513_v42 = vpop.f32.mrf.mxu1 }
 0x6cb   :  { %v1517_v43 = vadd.f32 %v1513_v42, %v1446_v41  ;;  %v2211_v42 = vld [vmem:[#allocation2 + $0x60] sm:$0xff] }
 0x6cc   :  { %v4768_v45 = vpop.f32.mrf.mxu1 }
 0x6cd   :  { %5067 = vtanh.f32 %v1517_v43 }
 0x6da   :  { %v5068_v46 = vpop.eup %5067 }
 0x6db   :  { %4772 = vmatmul.mubr.msk.f32.vlgmr.msra.gmra.mxu1 %vm344_vm2, %v5068_v46  ;;  %4783 = vmatmul.mubr.msk.f32.vlgmr.msra.gmra.mxu0 %vm344_vm2, %v5068_v46 }
 0x6dc   :  { %4787 = vmatprep.mubr.msk.f32.mxu1 %vm5177_vm0, %v5176_v0  ;;  %4803 = vmatprep.mubr.msk.f32.mxu0 %vm5177_vm0, %v5176_v0 }
 0x6dd   :  { %4786 = vmatpush3.xpose.msk.msra.mxu1 %vm344_vm2, %v4297_v61  ;;  %4802 = vmatpush3.xpose.msk.msra.mxu0 %vm344_vm2, %v4301_v11 }
 0x6de   :  { %4790 = vmatprep.subr.mxu1 %v5176_v0  ;;  %4806 = vmatprep.subr.mxu0 %v5176_v0 }
 0x79b   :  { %v1593_v62 = vpop.f32.mrf.mxu1  ;;  %v1666_v1 = vpop.f32.mrf.mxu0 }
 0x79c   :  { %v1597_v2 = vadd.f32 %v1593_v62, %v1444_v39  ;;  %v1670_v3 = vadd.f32 %v1666_v1, %v1599_v63 }
 0x79d   :  { %v4773_v8 = vpop.f32.mrf.mxu1  ;;  %v4784_v9 = vpop.f32.mrf.mxu0 }
 0x79e   :  { %5069 = vtanh.f32 %v1670_v3 }
 0x7ab   :  { %v5070_v10 = vpop.eup %5069 }
 0x7ac   :  { %4788 = vmatmul.mubr.msk.f32.vlgmr.msra.gmra.mxu1 %vm344_vm2, %v5070_v10 }
 0x7ad   :  { %4791 = vmatpush3.msra.mxu1 %v5240_v4  ;;  %4798 = vmatprep.mubr.msk.f32.mxu1 %vm5177_vm0, %v5176_v0 }
 0x7ae   :  { %4792 = vmatprep.subr.mxu1 %v5176_v0 }
 0x7af   :  { %4793 = vmatpush3.msra.mxu1 %v5245_v5 }
 0x7b0   :  { %4794 = vmatprep.subr.mxu1 %v5176_v0 }
 0x7b1   :  { %4795 = vmatpush3.msra.mxu1 %v5253_v6 }
 0x7b2   :  { %4796 = vmatprep.subr.mxu1 %v5176_v0 }
 0x7b3   :  { %4797 = vmatpush3.msra.mxu1 %v5261_v7 }
 0x7b4   :  { %4799 = vmatmul.mubr.msk.f32.vlgmr.msra.gmra.mxu1 %vm344_vm2, %v5070_v10  ;;  %4817 = vmatprep.subr.mxu1 %v5176_v0  ;;  %v2670_v10 = vld [vmem:[#allocation2 + $0x78] sm:$0xff] }
 0x7b5   :  { %4819 = vmatprep.mubr.msk.f32.mxu1 %vm5177_vm0, %v5176_v0  ;;  %4818 = vmatpush3.xpose.msk.msra.mxu1 %vm344_vm2, %v4305_v20 }
 0x7b6   :  { %4822 = vmatprep.subr.mxu1 %v5176_v0 }
 0x86c   :  { %v1746_v12 = vpop.f32.mrf.mxu1 }
 0x86d   :  { %v1750_v13 = vadd.f32 %v1746_v12, %v1597_v2  ;;  %v4325_v2 = vld [vmem:[%s5974_s5 + $0x78] sm:$0xff] }
 0x86e   :  { %v4789_v14 = vpop.f32.mrf.mxu1 }
 0x874   :  { %v1819_v16 = vpop.f32.mrf.mxu1 }
 0x875   :  { %v1823_v17 = vadd.f32 %v1819_v16, %v1752_v15  ;;  %v4329_v15 = vld [vmem:[%s5974_s5 + $0x80] sm:$0xff] }
 0x876   :  { %v4800_v18 = vpop.f32.mrf.mxu1 }
 0x877   :  { %5071 = vtanh.f32 %v1823_v17 }
 0x884   :  { %v5072_v19 = vpop.eup %5071 }
 0x885   :  { %4804 = vmatmul.mubr.msk.f32.vlgmr.msra.gmra.mxu0 %vm344_vm2, %v5072_v19 }
 0x886   :  { %4807 = vmatpush3.msra.mxu0 %v5240_v4  ;;  %4814 = vmatprep.mubr.msk.f32.mxu0 %vm5177_vm0, %v5176_v0 }
 0x887   :  { %4808 = vmatprep.subr.mxu0 %v5176_v0 }
 0x888   :  { %4809 = vmatpush3.msra.mxu0 %v5245_v5 }
 0x889   :  { %4810 = vmatprep.subr.mxu0 %v5176_v0 }
 0x88a   :  { %4811 = vmatpush3.msra.mxu0 %v5253_v6 }
 0x88b   :  { %4812 = vmatprep.subr.mxu0 %v5176_v0 }
 0x88c   :  { %4813 = vmatpush3.msra.mxu0 %v5261_v7 }
 0x88d   :  { %4815 = vmatmul.mubr.msk.f32.vlgmr.msra.gmra.mxu0 %vm344_vm2, %v5072_v19  ;;  %4833 = vmatprep.subr.mxu0 %v5176_v0  ;;  %v2823_v19 = vld [vmem:[#allocation2 + $0x80] sm:$0xff] }
 0x88e   :  { %4835 = vmatprep.mubr.msk.f32.mxu0 %vm5177_vm0, %v5176_v0  ;;  %4834 = vmatpush3.xpose.msk.msra.mxu0 %vm344_vm2, %v4309_v29 }
 0x88f   :  { %4838 = vmatprep.subr.mxu0 %v5176_v0 }
 0x945   :  { %v1899_v21 = vpop.f32.mrf.mxu0 }
 0x946   :  { %v1903_v22 = vadd.f32 %v1899_v21, %v1750_v13 }
 0x947   :  { %v4805_v23 = vpop.f32.mrf.mxu0 }
 0x94d   :  { %v1972_v25 = vpop.f32.mrf.mxu0 }
 0x94e   :  { %v1976_v26 = vadd.f32 %v1972_v25, %v1905_v24  ;;  %v4333_v24 = vld [vmem:[%s5974_s5 + $0x88] sm:$0xff] }
 0x94f   :  { %v4816_v27 = vpop.f32.mrf.mxu0 }
 0x950   :  { %5073 = vtanh.f32 %v1976_v26 }
 0x95d   :  { %v5074_v28 = vpop.eup %5073 }
 0x95e   :  { %4820 = vmatmul.mubr.msk.f32.vlgmr.msra.gmra.mxu1 %vm344_vm2, %v5074_v28 }
 0x95f   :  { %4823 = vmatpush3.msra.mxu1 %v5240_v4  ;;  %4830 = vmatprep.mubr.msk.f32.mxu1 %vm5177_vm0, %v5176_v0 }
 0x960   :  { %4824 = vmatprep.subr.mxu1 %v5176_v0 }
 0x961   :  { %4825 = vmatpush3.msra.mxu1 %v5245_v5 }
 0x962   :  { %4826 = vmatprep.subr.mxu1 %v5176_v0 }
 0x963   :  { %4827 = vmatpush3.msra.mxu1 %v5253_v6 }
 0x964   :  { %4828 = vmatprep.subr.mxu1 %v5176_v0 }
 0x965   :  { %4829 = vmatpush3.msra.mxu1 %v5261_v7 }
 0x966   :  { %4831 = vmatmul.mubr.msk.f32.vlgmr.msra.gmra.mxu1 %vm344_vm2, %v5074_v28  ;;  %4849 = vmatprep.subr.mxu1 %v5176_v0  ;;  %v2976_v28 = vld [vmem:[#allocation2 + $0x88] sm:$0xff] }
 0x967   :  { %4851 = vmatprep.mubr.msk.f32.mxu1 %vm5177_vm0, %v5176_v0  ;;  %4850 = vmatpush3.xpose.msk.msra.mxu1 %vm344_vm2, %v4313_v38 }
 0x968   :  { %4854 = vmatprep.subr.mxu1 %v5176_v0 }
 0xa1e   :  { %v2052_v30 = vpop.f32.mrf.mxu1 }
 0xa1f   :  { %v2056_v31 = vadd.f32 %v2052_v30, %v1903_v22 }
 0xa20   :  { %v4821_v32 = vpop.f32.mrf.mxu1 }
 0xa26   :  { %v2125_v34 = vpop.f32.mrf.mxu1 }
 0xa27   :  { %v2129_v35 = vadd.f32 %v2125_v34, %v2058_v33  ;;  %v4337_v33 = vld [vmem:[%s5974_s5 + $0x90] sm:$0xff] }
 0xa28   :  { %v4832_v36 = vpop.f32.mrf.mxu1 }
 0xa29   :  { %5075 = vtanh.f32 %v2129_v35 }
 0xa36   :  { %v5076_v37 = vpop.eup %5075 }
 0xa37   :  { %4836 = vmatmul.mubr.msk.f32.vlgmr.msra.gmra.mxu0 %vm344_vm2, %v5076_v37 }
 0xa38   :  { %4839 = vmatpush3.msra.mxu0 %v5240_v4  ;;  %4846 = vmatprep.mubr.msk.f32.mxu0 %vm5177_vm0, %v5176_v0 }
 0xa39   :  { %4840 = vmatprep.subr.mxu0 %v5176_v0 }
 0xa3a   :  { %4841 = vmatpush3.msra.mxu0 %v5245_v5 }
 0xa3b   :  { %4842 = vmatprep.subr.mxu0 %v5176_v0 }
 0xa3c   :  { %4843 = vmatpush3.msra.mxu0 %v5253_v6 }
 0xa3d   :  { %4844 = vmatprep.subr.mxu0 %v5176_v0 }
 0xa3e   :  { %4845 = vmatpush3.msra.mxu0 %v5261_v7 }
 0xa3f   :  { %4847 = vmatmul.mubr.msk.f32.vlgmr.msra.gmra.mxu0 %vm344_vm2, %v5076_v37  ;;  %4865 = vmatprep.subr.mxu0 %v5176_v0  ;;  %v3129_v37 = vld [vmem:[#allocation2 + $0x90] sm:$0xff] }
 0xa40   :  { %4867 = vmatprep.mubr.msk.f32.mxu0 %vm5177_vm0, %v5176_v0 }
 0xaf7   :  { %v2205_v39 = vpop.f32.mrf.mxu0 }
 0xaf8   :  { %v2209_v40 = vadd.f32 %v2205_v39, %v2056_v31 }
 0xaf9   :  { %v4837_v41 = vpop.f32.mrf.mxu0 }
 0xaff   :  { %v2278_v43 = vpop.f32.mrf.mxu0 }
 0xb00   :  { %v2282_v45 = vadd.f32 %v2278_v43, %v2211_v42  ;;  %v4341_v42 = vld [vmem:[%s5974_s5 + $0x98] sm:$0xff] }
 0xb01   :  { %v4848_v46 = vpop.f32.mrf.mxu0 }
 0xb02   :  { %5077 = vtanh.f32 %v2282_v45 }
 0xb0f   :  { %v5078_v47 = vpop.eup %5077 }
 0xb10   :  { %4852 = vmatmul.mubr.msk.f32.vlgmr.msra.gmra.mxu1 %vm344_vm2, %v5078_v47 }
 0xb11   :  { %4855 = vmatpush3.msra.mxu1 %v5240_v4  ;;  %4862 = vmatprep.mubr.msk.f32.mxu1 %vm5177_vm0, %v5176_v0  ;;  %v4317_v4 = vld [vmem:[%s5974_s5 + $0x68] sm:$0xff] }
 0xb12   :  { %4856 = vmatprep.subr.mxu1 %v5176_v0  ;;  %4866 = vmatpush3.xpose.msk.msra.mxu0 %vm344_vm2, %v4317_v4 }
 0xb13   :  { %4857 = vmatpush3.msra.mxu1 %v5245_v5  ;;  %4870 = vmatprep.subr.mxu0 %v5176_v0 }
 0xb14   :  { %4858 = vmatprep.subr.mxu1 %v5176_v0 }
 0xb15   :  { %4859 = vmatpush3.msra.mxu1 %v5253_v6 }
 0xb16   :  { %4860 = vmatprep.subr.mxu1 %v5176_v0 }
 0xb17   :  { %4861 = vmatpush3.msra.mxu1 %v5261_v7 }
 0xb18   :  { %4863 = vmatmul.mubr.msk.f32.vlgmr.msra.gmra.mxu1 %vm344_vm2, %v5078_v47  ;;  %4881 = vmatprep.subr.mxu1 %v5176_v0  ;;  %v3282_v47 = vld [vmem:[#allocation2 + $0x98] sm:$0xff] }
 0xb19   :  { %4883 = vmatprep.mubr.msk.f32.mxu1 %vm5177_vm0, %v5176_v0  ;;  %4882 = vmatpush3.xpose.msk.msra.mxu1 %vm344_vm2, %v4321_v56 }
 0xb1a   :  { %4886 = vmatprep.subr.mxu1 %v5176_v0 }
 0xbd0   :  { %v2358_v5 = vpop.f32.mrf.mxu1 }
 0xbd1   :  { %v2362_v6 = vadd.f32 %v2358_v5, %v2209_v40 }
 0xbd2   :  { %v4853_v44 = vpop.f32.mrf.mxu1 }
 0xbd8   :  { %v2431_v7 = vpop.f32.mrf.mxu1 }
 0xbd9   :  { %v2435_v49 = vadd.f32 %v2431_v7, %v2364_v48  ;;  %v4345_v48 = vld [vmem:[%s5974_s5 + $0xa0] sm:$0xff] }
 0xbda   :  { %v4864_v50 = vpop.f32.mrf.mxu1 }
 0xbdb   :  { %5079 = vtanh.f32 %v2435_v49 }
 0xbe8   :  { %v5080_v51 = vpop.eup %5079 }
 0xbe9   :  { %4868 = vmatmul.mubr.msk.f32.vlgmr.msra.gmra.mxu0 %vm344_vm2, %v5080_v51 }
 0xbea   :  { %4871 = vmatpush3.msra.mxu0 %v5737_v52  ;;  %4878 = vmatprep.mubr.msk.f32.mxu0 %vm5177_vm0, %v5176_v0 }
 0xbeb   :  { %4872 = vmatprep.subr.mxu0 %v5176_v0 }
 0xbec   :  { %4873 = vmatpush3.msra.mxu0 %v5746_v53 }
 0xbed   :  { %4874 = vmatprep.subr.mxu0 %v5176_v0 }
 0xbee   :  { %4875 = vmatpush3.msra.mxu0 %v5753_v54 }
 0xbef   :  { %4876 = vmatprep.subr.mxu0 %v5176_v0 }
 0xbf0   :  { %4877 = vmatpush3.msra.mxu0 %v5760_v55 }
 0xbf1   :  { %4879 = vmatmul.mubr.msk.f32.vlgmr.msra.gmra.mxu0 %vm344_vm2, %v5080_v51  ;;  %4897 = vmatprep.subr.mxu0 %v5176_v0  ;;  %v3435_v51 = vld [vmem:[#allocation2 + $0xa0] sm:$0xff] }
 0xbf2   :  { %4899 = vmatprep.mubr.msk.f32.mxu0 %vm5177_vm0, %v5176_v0  ;;  %4898 = vmatpush3.xpose.msk.msra.mxu0 %vm344_vm2, %v4325_v2 }
 0xbf3   :  { %4902 = vmatprep.subr.mxu0 %v5176_v0 }
 0xca9   :  { %v2511_v57 = vpop.f32.mrf.mxu0 }
 0xcaa   :  { %v2515_v58 = vadd.f32 %v2511_v57, %v2362_v6 }
 0xcab   :  { %v4869_v59 = vpop.f32.mrf.mxu0 }
 0xcb1   :  { %v2584_v61 = vpop.f32.mrf.mxu0 }
 0xcb2   :  { %v2588_v62 = vadd.f32 %v2584_v61, %v2517_v60  ;;  %v4349_v60 = vld [vmem:[%s5974_s5 + $0xa8] sm:$0xff] }
 0xcb3   :  { %v4880_v63 = vpop.f32.mrf.mxu0 }
 0xcb4   :  { %5081 = vtanh.f32 %v2588_v62 }
 0xcc1   :  { %v5082_v1 = vpop.eup %5081 }
 0xcc2   :  { %4884 = vmatmul.mubr.msk.f32.vlgmr.msra.gmra.mxu1 %vm344_vm2, %v5082_v1 }
 0xcc3   :  { %4887 = vmatpush3.msra.mxu1 %v5737_v52  ;;  %4894 = vmatprep.mubr.msk.f32.mxu1 %vm5177_vm0, %v5176_v0 }
 0xcc4   :  { %4888 = vmatprep.subr.mxu1 %v5176_v0 }
 0xcc5   :  { %4889 = vmatpush3.msra.mxu1 %v5746_v53 }
 0xcc6   :  { %4890 = vmatprep.subr.mxu1 %v5176_v0 }
 0xcc7   :  { %4891 = vmatpush3.msra.mxu1 %v5753_v54 }
 0xcc8   :  { %4892 = vmatprep.subr.mxu1 %v5176_v0 }
 0xcc9   :  { %4893 = vmatpush3.msra.mxu1 %v5760_v55 }
 0xcca   :  { %4895 = vmatmul.mubr.msk.f32.vlgmr.msra.gmra.mxu1 %vm344_vm2, %v5082_v1  ;;  %4913 = vmatprep.subr.mxu1 %v5176_v0  ;;  %v3588_v1 = vld [vmem:[#allocation2 + $0xa8] sm:$0xff] }
 0xccb   :  { %4915 = vmatprep.mubr.msk.f32.mxu1 %vm5177_vm0, %v5176_v0  ;;  %4914 = vmatpush3.xpose.msk.msra.mxu1 %vm344_vm2, %v4329_v15 }
 0xccc   :  { %4918 = vmatprep.subr.mxu1 %v5176_v0 }
 0xd82   :  { %v2664_v3 = vpop.f32.mrf.mxu1 }
 0xd83   :  { %v2668_v8 = vadd.f32 %v2664_v3, %v2515_v58 }
 0xd84   :  { %v4885_v9 = vpop.f32.mrf.mxu1 }
 0xd8a   :  { %v2737_v11 = vpop.f32.mrf.mxu1 }
 0xd8b   :  { %v2741_v12 = vadd.f32 %v2737_v11, %v2670_v10  ;;  %v4353_v10 = vld [vmem:[%s5974_s5 + $0xb0] sm:$0xff] }
 0xd8c   :  { %v4896_v13 = vpop.f32.mrf.mxu1 }
 0xd8d   :  { %5083 = vtanh.f32 %v2741_v12 }
 0xd9a   :  { %v5084_v14 = vpop.eup %5083 }
 0xd9b   :  { %4900 = vmatmul.mubr.msk.f32.vlgmr.msra.gmra.mxu0 %vm344_vm2, %v5084_v14 }
 0xd9c   :  { %4903 = vmatpush3.msra.mxu0 %v5737_v52  ;;  %4910 = vmatprep.mubr.msk.f32.mxu0 %vm5177_vm0, %v5176_v0 }
 0xd9d   :  { %4904 = vmatprep.subr.mxu0 %v5176_v0 }
 0xd9e   :  { %4905 = vmatpush3.msra.mxu0 %v5746_v53 }
 0xd9f   :  { %4906 = vmatprep.subr.mxu0 %v5176_v0 }
 0xda0   :  { %4907 = vmatpush3.msra.mxu0 %v5753_v54 }
 0xda1   :  { %4908 = vmatprep.subr.mxu0 %v5176_v0 }
 0xda2   :  { %4909 = vmatpush3.msra.mxu0 %v5760_v55 }
 0xda3   :  { %4911 = vmatmul.mubr.msk.f32.vlgmr.msra.gmra.mxu0 %vm344_vm2, %v5084_v14  ;;  %4929 = vmatprep.subr.mxu0 %v5176_v0  ;;  %v3741_v14 = vld [vmem:[#allocation2 + $0xb0] sm:$0xff] }
 0xda4   :  { %4931 = vmatprep.mubr.msk.f32.mxu0 %vm5177_vm0, %v5176_v0  ;;  %4930 = vmatpush3.xpose.msk.msra.mxu0 %vm344_vm2, %v4333_v24 }
 0xda5   :  { %4934 = vmatprep.subr.mxu0 %v5176_v0 }
 0xe5b   :  { %v2817_v16 = vpop.f32.mrf.mxu0 }
 0xe5c   :  { %v2821_v17 = vadd.f32 %v2817_v16, %v2668_v8 }
 0xe5d   :  { %v4901_v18 = vpop.f32.mrf.mxu0 }
 0xe63   :  { %v2890_v20 = vpop.f32.mrf.mxu0 }
 0xe64   :  { %v2894_v21 = vadd.f32 %v2890_v20, %v2823_v19  ;;  %v4357_v19 = vld [vmem:[%s5974_s5 + $0xb8] sm:$0xff] }
 0xe65   :  { %v4912_v22 = vpop.f32.mrf.mxu0 }
 0xe66   :  { %5085 = vtanh.f32 %v2894_v21 }
 0xe73   :  { %v5086_v23 = vpop.eup %5085 }
 0xe74   :  { %4916 = vmatmul.mubr.msk.f32.vlgmr.msra.gmra.mxu1 %vm344_vm2, %v5086_v23 }
 0xe75   :  { %4919 = vmatpush3.msra.mxu1 %v5737_v52  ;;  %4926 = vmatprep.mubr.msk.f32.mxu1 %vm5177_vm0, %v5176_v0 }
 0xe76   :  { %4920 = vmatprep.subr.mxu1 %v5176_v0 }
 0xe77   :  { %4921 = vmatpush3.msra.mxu1 %v5746_v53 }
 0xe78   :  { %4922 = vmatprep.subr.mxu1 %v5176_v0 }
 0xe79   :  { %4923 = vmatpush3.msra.mxu1 %v5753_v54 }
 0xe7a   :  { %4924 = vmatprep.subr.mxu1 %v5176_v0 }
 0xe7b   :  { %4925 = vmatpush3.msra.mxu1 %v5760_v55 }
 0xe7c   :  { %4927 = vmatmul.mubr.msk.f32.vlgmr.msra.gmra.mxu1 %vm344_vm2, %v5086_v23  ;;  %4945 = vmatprep.subr.mxu1 %v5176_v0  ;;  %v3894_v23 = vld [vmem:[#allocation2 + $0xb8] sm:$0xff] }
 0xe7d   :  { %4947 = vmatprep.mubr.msk.f32.mxu1 %vm5177_vm0, %v5176_v0  ;;  %4946 = vmatpush3.xpose.msk.msra.mxu1 %vm344_vm2, %v4337_v33 }
 0xe7e   :  { %4950 = vmatprep.subr.mxu1 %v5176_v0 }
 0xf34   :  { %v2970_v25 = vpop.f32.mrf.mxu1 }
 0xf35   :  { %v2974_v26 = vadd.f32 %v2970_v25, %v2821_v17 }
 0xf36   :  { %v4917_v27 = vpop.f32.mrf.mxu1 }
 0xf3c   :  { %v3043_v29 = vpop.f32.mrf.mxu1 }
 0xf3d   :  { %v3047_v30 = vadd.f32 %v3043_v29, %v2976_v28 }
 0xf3e   :  { %v4928_v31 = vpop.f32.mrf.mxu1 }
 0xf3f   :  { %5087 = vtanh.f32 %v3047_v30 }
 0xf4c   :  { %v5088_v32 = vpop.eup %5087 }
 0xf4d   :  { %4932 = vmatmul.mubr.msk.f32.vlgmr.msra.gmra.mxu0 %vm344_vm2, %v5088_v32 }
 0xf4e   :  { %4935 = vmatpush3.msra.mxu0 %v5737_v52  ;;  %4942 = vmatprep.mubr.msk.f32.mxu0 %vm5177_vm0, %v5176_v0 }
 0xf4f   :  { %4936 = vmatprep.subr.mxu0 %v5176_v0 }
 0xf50   :  { %4937 = vmatpush3.msra.mxu0 %v5746_v53 }
 0xf51   :  { %4938 = vmatprep.subr.mxu0 %v5176_v0 }
 0xf52   :  { %4939 = vmatpush3.msra.mxu0 %v5753_v54 }
 0xf53   :  { %4940 = vmatprep.subr.mxu0 %v5176_v0 }
 0xf54   :  { %4941 = vmatpush3.msra.mxu0 %v5760_v55 }
 0xf55   :  { %4943 = vmatmul.mubr.msk.f32.vlgmr.msra.gmra.mxu0 %vm344_vm2, %v5088_v32  ;;  %4961 = vmatprep.subr.mxu0 %v5176_v0 }
 0xf56   :  { %4963 = vmatprep.mubr.msk.f32.mxu0 %vm5177_vm0, %v5176_v0  ;;  %4962 = vmatpush3.xpose.msk.msra.mxu0 %vm344_vm2, %v4341_v42 }
 0xf57   :  { %4966 = vmatprep.subr.mxu0 %v5176_v0 }
0x100d   :  { %v3123_v34 = vpop.f32.mrf.mxu0 }
0x100e   :  { %v3127_v35 = vadd.f32 %v3123_v34, %v2974_v26 }
0x100f   :  { %v4933_v36 = vpop.f32.mrf.mxu0 }
0x1015   :  { %v3196_v38 = vpop.f32.mrf.mxu0 }
0x1016   :  { %v3200_v39 = vadd.f32 %v3196_v38, %v3129_v37 }
0x1017   :  { %v4944_v40 = vpop.f32.mrf.mxu0 }
0x1018   :  { %5089 = vtanh.f32 %v3200_v39 }
0x1025   :  { %v5090_v41 = vpop.eup %5089 }
0x1026   :  { %4948 = vmatmul.mubr.msk.f32.vlgmr.msra.gmra.mxu1 %vm344_vm2, %v5090_v41 }
0x1027   :  { %4951 = vmatpush3.msra.mxu1 %v5737_v52  ;;  %4958 = vmatprep.mubr.msk.f32.mxu1 %vm5177_vm0, %v5176_v0 }
0x1028   :  { %4952 = vmatprep.subr.mxu1 %v5176_v0 }
0x1029   :  { %4953 = vmatpush3.msra.mxu1 %v5746_v53 }
0x102a   :  { %4954 = vmatprep.subr.mxu1 %v5176_v0 }
0x102b   :  { %4955 = vmatpush3.msra.mxu1 %v5753_v54 }
0x102c   :  { %4956 = vmatprep.subr.mxu1 %v5176_v0 }
0x102d   :  { %4957 = vmatpush3.msra.mxu1 %v5760_v55 }
0x102e   :  { %4959 = vmatmul.mubr.msk.f32.vlgmr.msra.gmra.mxu1 %vm344_vm2, %v5090_v41  ;;  %4977 = vmatprep.subr.mxu1 %v5176_v0 }
0x102f   :  { %4979 = vmatprep.mubr.msk.f32.mxu1 %vm5177_vm0, %v5176_v0  ;;  %4978 = vmatpush3.xpose.msk.msra.mxu1 %vm344_vm2, %v4345_v48 }
0x1030   :  { %4982 = vmatprep.subr.mxu1 %v5176_v0 }
0x10e6   :  { %v3276_v43 = vpop.f32.mrf.mxu1 }
0x10e7   :  { %v3280_v45 = vadd.f32 %v3276_v43, %v3127_v35 }
0x10e8   :  { %v4949_v46 = vpop.f32.mrf.mxu1 }
0x10ee   :  { %v3349_v4 = vpop.f32.mrf.mxu1 }
0x10ef   :  { %v3353_v5 = vadd.f32 %v3349_v4, %v3282_v47 }
0x10f0   :  { %v4960_v6 = vpop.f32.mrf.mxu1 }
0x10f1   :  { %5091 = vtanh.f32 %v3353_v5 }
0x10fe   :  { %v5092_v44 = vpop.eup %5091 }
0x10ff   :  { %4964 = vmatmul.mubr.msk.f32.vlgmr.msra.gmra.mxu0 %vm344_vm2, %v5092_v44 }
0x1100   :  { %4967 = vmatpush3.msra.mxu0 %v5737_v52  ;;  %4974 = vmatprep.mubr.msk.f32.mxu0 %vm5177_vm0, %v5176_v0 }
0x1101   :  { %4968 = vmatprep.subr.mxu0 %v5176_v0 }
0x1102   :  { %4969 = vmatpush3.msra.mxu0 %v5746_v53 }
0x1103   :  { %4970 = vmatprep.subr.mxu0 %v5176_v0 }
0x1104   :  { %4971 = vmatpush3.msra.mxu0 %v5753_v54 }
0x1105   :  { %4972 = vmatprep.subr.mxu0 %v5176_v0 }
0x1106   :  { %4973 = vmatpush3.msra.mxu0 %v5760_v55 }
0x1107   :  { %4975 = vmatmul.mubr.msk.f32.vlgmr.msra.gmra.mxu0 %vm344_vm2, %v5092_v44  ;;  %4993 = vmatprep.subr.mxu0 %v5176_v0 }
0x1108   :  { %4995 = vmatprep.mubr.msk.f32.mxu0 %vm5177_vm0, %v5176_v0  ;;  %4994 = vmatpush3.xpose.msk.msra.mxu0 %vm344_vm2, %v4349_v60 }
0x1109   :  { %4998 = vmatprep.subr.mxu0 %v5176_v0 }
0x11bf   :  { %v3429_v7 = vpop.f32.mrf.mxu0 }
0x11c0   :  { %v3433_v49 = vadd.f32 %v3429_v7, %v3280_v45 }
0x11c1   :  { %v4965_v50 = vpop.f32.mrf.mxu0 }
0x11c7   :  { %v3502_v56 = vpop.f32.mrf.mxu0 }
0x11c8   :  { %v3506_v57 = vadd.f32 %v3502_v56, %v3435_v51 }
0x11c9   :  { %v4976_v58 = vpop.f32.mrf.mxu0 }
0x11ca   :  { %5093 = vtanh.f32 %v3506_v57 }
0x11d7   :  { %v5094_v59 = vpop.eup %5093 }
0x11d8   :  { %4980 = vmatmul.mubr.msk.f32.vlgmr.msra.gmra.mxu1 %vm344_vm2, %v5094_v59 }
0x11d9   :  { %4983 = vmatpush3.msra.mxu1 %v5737_v52  ;;  %4990 = vmatprep.mubr.msk.f32.mxu1 %vm5177_vm0, %v5176_v0 }
0x11da   :  { %4984 = vmatprep.subr.mxu1 %v5176_v0 }
0x11db   :  { %4985 = vmatpush3.msra.mxu1 %v5746_v53 }
0x11dc   :  { %4986 = vmatprep.subr.mxu1 %v5176_v0 }
0x11dd   :  { %4987 = vmatpush3.msra.mxu1 %v5753_v54 }
0x11de   :  { %4988 = vmatprep.subr.mxu1 %v5176_v0 }
0x11df   :  { %4989 = vmatpush3.msra.mxu1 %v5760_v55 }
0x11e0   :  { %4991 = vmatmul.mubr.msk.f32.vlgmr.msra.gmra.mxu1 %vm344_vm2, %v5094_v59  ;;  %5009 = vmatprep.subr.mxu1 %v5176_v0 }
0x11e1   :  { %5011 = vmatprep.mubr.msk.f32.mxu1 %vm5177_vm0, %v5176_v0  ;;  %5010 = vmatpush3.xpose.msk.msra.mxu1 %vm344_vm2, %v4353_v10 }
0x11e2   :  { %5014 = vmatprep.subr.mxu1 %v5176_v0 }
0x1298   :  { %v3582_v61 = vpop.f32.mrf.mxu1 }
0x1299   :  { %v3586_v62 = vadd.f32 %v3582_v61, %v3433_v49 }
0x129a   :  { %v4981_v63 = vpop.f32.mrf.mxu1 }
0x12a0   :  { %v3655_v2 = vpop.f32.mrf.mxu1 }
0x12a1   :  { %v3659_v3 = vadd.f32 %v3655_v2, %v3588_v1 }
0x12a2   :  { %v4992_v8 = vpop.f32.mrf.mxu1 }
0x12a3   :  { %5095 = vtanh.f32 %v3659_v3 }
0x12b0   :  { %v5096_v9 = vpop.eup %5095 }
0x12b1   :  { %4996 = vmatmul.mubr.msk.f32.vlgmr.msra.gmra.mxu0 %vm344_vm2, %v5096_v9 }
0x12b2   :  { %4999 = vmatpush3.msra.mxu0 %v5737_v52  ;;  %5006 = vmatprep.mubr.msk.f32.mxu0 %vm5177_vm0, %v5176_v0 }
0x12b3   :  { %5000 = vmatprep.subr.mxu0 %v5176_v0 }
0x12b4   :  { %5001 = vmatpush3.msra.mxu0 %v5746_v53 }
0x12b5   :  { %5002 = vmatprep.subr.mxu0 %v5176_v0 }
0x12b6   :  { %5003 = vmatpush3.msra.mxu0 %v5753_v54 }
0x12b7   :  { %5004 = vmatprep.subr.mxu0 %v5176_v0 }
0x12b8   :  { %5005 = vmatpush3.msra.mxu0 %v5760_v55 }
0x12b9   :  { %5007 = vmatmul.mubr.msk.f32.vlgmr.msra.gmra.mxu0 %vm344_vm2, %v5096_v9  ;;  %5025 = vmatprep.subr.mxu0 %v5176_v0 }
0x12ba   :  { %5027 = vmatprep.mubr.msk.f32.mxu0 %vm5177_vm0, %v5176_v0  ;;  %5026 = vmatpush3.xpose.msk.msra.mxu0 %vm344_vm2, %v4357_v19 }
0x12bb   :  { %5030 = vmatprep.subr.mxu0 %v5176_v0 }
0x1371   :  { %v3735_v11 = vpop.f32.mrf.mxu0 }
0x1372   :  { %v3739_v12 = vadd.f32 %v3735_v11, %v3586_v62 }
0x1373   :  { %v4997_v13 = vpop.f32.mrf.mxu0 }
0x1379   :  { %v3808_v15 = vpop.f32.mrf.mxu0 }
0x137a   :  { %v3812_v16 = vadd.f32 %v3808_v15, %v3741_v14 }
0x137b   :  { %v5008_v17 = vpop.f32.mrf.mxu0 }
0x137c   :  { %5097 = vtanh.f32 %v3812_v16 }
0x1389   :  { %v5098_v18 = vpop.eup %5097 }
0x138a   :  { %5012 = vmatmul.mubr.msk.f32.vlgmr.msra.gmra.mxu1 %vm344_vm2, %v5098_v18 }
0x138b   :  { %5015 = vmatpush3.msra.mxu1 %v5737_v52  ;;  %5022 = vmatprep.mubr.msk.f32.mxu1 %vm5177_vm0, %v5176_v0 }
0x138c   :  { %5016 = vmatprep.subr.mxu1 %v5176_v0 }
0x138d   :  { %5017 = vmatpush3.msra.mxu1 %v5746_v53 }
0x138e   :  { %5018 = vmatprep.subr.mxu1 %v5176_v0 }
0x138f   :  { %5019 = vmatpush3.msra.mxu1 %v5753_v54 }
0x1390   :  { %5020 = vmatprep.subr.mxu1 %v5176_v0 }
0x1391   :  { %5021 = vmatpush3.msra.mxu1 %v5760_v55 }
0x1392   :  { %5023 = vmatmul.mubr.msk.f32.vlgmr.msra.gmra.mxu1 %vm344_vm2, %v5098_v18  ;;  %5041 = vmatprep.subr.mxu1 %v5176_v0 }
0x1393   :  { %5043 = vmatprep.mubr.msk.f32.mxu1 %vm5177_vm0, %v5176_v0 }
0x144a   :  { %v3888_v20 = vpop.f32.mrf.mxu1 }
0x144b   :  { %v3892_v21 = vadd.f32 %v3888_v20, %v3739_v12 }
0x144c   :  { %v5013_v22 = vpop.f32.mrf.mxu1 }
0x1452   :  { %v3961_v24 = vpop.f32.mrf.mxu1 }
0x1453   :  { %v3965_v25 = vadd.f32 %v3961_v24, %v3894_v23 }
0x1454   :  { %v5024_v26 = vpop.f32.mrf.mxu1 }
0x1455   :  { %5099 = vtanh.f32 %v3965_v25 }
0x1462   :  { %v5100_v27 = vpop.eup %5099 }
0x1463   :  { %5028 = vmatmul.mubr.msk.f32.vlgmr.msra.gmra.mxu0 %vm344_vm2, %v5100_v27 }
0x1464   :  { %5031 = vmatpush3.msra.mxu0 %v5737_v52  ;;  %5038 = vmatprep.mubr.msk.f32.mxu0 %vm5177_vm0, %v5176_v0  ;;  %v4361_v52 = vld [vmem:[%s5974_s5 + $0xc0] sm:$0xff] }
0x1465   :  { %5032 = vmatprep.subr.mxu0 %v5176_v0  ;;  %5042 = vmatpush3.xpose.msk.msra.mxu1 %vm344_vm2, %v4361_v52 }
0x1466   :  { %5033 = vmatpush3.msra.mxu0 %v5746_v53  ;;  %v4047_v53 = vld [vmem:[#allocation2 + $0xc0] sm:$0xff] }
0x1467   :  { %5034 = vmatprep.subr.mxu0 %v5176_v0 }
0x1468   :  { %5035 = vmatpush3.msra.mxu0 %v5753_v54 }
0x1469   :  { %5036 = vmatprep.subr.mxu0 %v5176_v0 }
0x146a   :  { %5037 = vmatpush3.msra.mxu0 %v5760_v55 }
0x146b   :  { %5039 = vmatmul.mubr.msk.f32.vlgmr.msra.gmra.mxu0 %vm344_vm2, %v5100_v27 }
0x1523   :  { %v4041_v28 = vpop.f32.mrf.mxu0 }
0x1524   :  { %v4045_v29 = vadd.f32 %v4041_v28, %v3892_v21 }
0x1525   :  { %v5029_v30 = vpop.f32.mrf.mxu0 }
0x152b   :  { %v4114_v31 = vpop.f32.mrf.mxu0 }
0x152c   :  { %v4118_v32 = vadd.f32 %v4114_v31, %v4047_v53 }
0x152d   :  { %v5040_v33 = vpop.f32.mrf.mxu0 }
0x152e   :  { %5101 = vtanh.f32 %v4118_v32 }
0x153b   :  { %v5102_v54 = vpop.eup %5101 }
0x153c   :  { %4209 = vst.msk [vmem:[#allocation7] sm:$0xff] %vm344_vm2, %v5102_v54  ;;  %5044 = vmatmul.mubr.msk.f32.vlgmr.msra.gmra.mxu1 %vm344_vm2, %v5102_v54 }
0x153d   :  { %5138 = shalt.err (!%p5135_p9)
}
0x153e   :  { %4229 = dma.vmem_to_hbm [thread:$0]  %s4227_s27, 128, %s5977_s8, [#allocation8]   ;;  %v4364_v55 = vld [vmem:[%s5975_s6] ss:$0 sm:$0xff]  ;;  %vm4207_vm3 = vcmask 64512  }
0x153f   :  { %s5179_s10 = smov [#allocation6]  }
0x1540   :  { %s4216_s3 = sshll.u32 %s5179_s10, 4  ;;  %s4217_s3 = int_to_ptr.vmem [resolvable:$true] %s4216_s3 }
0x1541   :  { %s5147_s11 = scalar_lea.vmem %s4217_s3, 128  ;;  %p5152_p11 = scmp.lt.s32.totalorder %s4217_s3, %s4217_s3 }
0x1542   :  { %p5148_p10 = scmp.ne.s32.totalorder %s4217_s3, %s5147_s11  ;;  %p5153_p12 = scmp.lt.s32.totalorder %s5147_s11, %s5147_s11 }
0x1544   :  { %p5154_p13 = por %p5153_p12, %p5152_p11 }
0x1546   :  { %p5155_p0 = pnand %p5154_p13, %p5148_p10 }
0x15fc   :  { %v4194_v0 = vpop.f32.mrf.mxu1 }
0x15fd   :  { %v4198_v34 = vadd.f32 %v4194_v0, %v4045_v29 }
0x15fe   :  { %v5045_v35 = vpop.f32.mrf.mxu1 }
0x15ff   :  { %v4206_v36 = vadd.f32 %v4364_v55, %v4198_v34 }
0x1601   :  { %4208 = vst.msk [vmem:[#allocation6] sm:$0xff] %vm4207_vm3, %v4206_v36 }
0x1602   :  { %5158 = shalt.err (!%p5155_p0)
}
0x1603   :  { %4219 = dma.vmem_to_hbm [thread:$0]  %s4217_s3, 128, %s5976_s7, [#allocation5]  }
0x1604   :  { %5169 = dma.done.wait [#allocation5], 128  }
0x1605   :  { %5170 = vsyncadd [#allocation5], 4294967168 }
0x1606   :  { %5171 = dma.done.wait [#allocation8], 128  }
0x1607   :  { %5172 = vsyncadd [#allocation8], 4294967168 }
0x1608   :  { %4236 = vsyncpa [#allocation4], 1 }
0x1609   :  { %4237 = vsyncpa [#allocation5], 1 }
0x160a   :  { %4238 = vsyncpa [#allocation8], 1 }

</bundles_post_ra>
